<compile_context>
chip_gen: v7x
topology: tpu7x:2x2x1
jax: 0.10.0
libtpu: 0.0.40
codegen_flags: <defaults>
</compile_context>

<pallas_src>
import numpy as np
import jax
import jax.numpy as jnp
from jax import lax
from jax.experimental import pallas as pl
from jax.experimental.pallas import tpu as pltpu

# ---------------- configuration ----------------
N, CIN, H, W = 2, 4, 16, 16
PLANES = 8
K = 3
PAD = 1
STRIDE = 2
H2, W2 = H // STRIDE, W // STRIDE
HP, WP = H + 2 * PAD, W + 2 * PAD      # padded spatial dims for conv1
WPC = WP * CIN                         # padded-row lane width for the input (72)
LW = W * PLANES                        # full-res lane width (128)  -> lane dense
LW2 = W2 * PLANES                      # pooled lane width (64)
EPS = 1e-5                             # PyTorch BatchNorm default eps


# ---------------- constant (numpy) helper matrices ----------------
def _bands():
    # conv1 band:  band1[dx, a, b] = 1 iff padded col a == output col b + dx
    band1 = np.stack(
        [(np.arange(WP)[:, None] == (np.arange(W)[None, :] + dx)) for dx in range(K)]
    ).astype(np.float32)                                       # (K, 18, 16)
    # shortcut (1x1) band: padded col a == output col b + 1 (skip the padding col)
    bands = (np.arange(WP)[:, None] == (np.arange(W)[None, :] + 1)).astype(np.float32)
    # conv2 band (input NOT W-padded): a == b + dx - 1, invalid taps omitted
    band2 = np.stack(
        [(np.arange(W2)[:, None] == (np.arange(W2)[None, :] + dx - 1)) for dx in range(K)]
    ).astype(np.float32)                                       # (K, 8, 8)
    return band1, bands, band2


def _pool_mats():
    # Lane (W) pooling: one-hot column selectors for even / odd pixels.
    sw0 = np.zeros((LW, LW2), np.float32)
    sw1 = np.zeros((LW, LW2), np.float32)
    for x2 in range(W2):
        for c in range(PLANES):
            sw0[(2 * x2) * PLANES + c, x2 * PLANES + c] = 1.0
            sw1[(2 * x2 + 1) * PLANES + c, x2 * PLANES + c] = 1.0
    # Sublane (H) pooling: one-hot row selectors for even / odd rows.
    sh0 = np.zeros((H2, H), np.float32)
    sh1 = np.zeros((H2, H), np.float32)
    for y2 in range(H2):
        sh0[y2, 2 * y2] = 1.0
        sh1[y2, 2 * y2 + 1] = 1.0
    return sw0, sw1, sh0, sh1


_BAND1, _BANDS, _BAND2 = _bands()
_SW0, _SW1, _SH0, _SH1 = _pool_mats()


# ---------------- the fused Pallas kernel ----------------
def basic_block_kernel(xp_ref, w1b_ref, wsb_ref, w2b_ref,
                       b1_ref, sb_ref, b2_ref,
                       sw0_ref, sw1_ref, sh0_ref, sh1_ref,
                       out_ref, mp_ref):
    f32 = jnp.float32
    sw0 = sw0_ref[...]
    sw1 = sw1_ref[...]
    sh0 = sh0_ref[...]
    sh1 = sh1_ref[...]

    def pool2(m):
        # 2x2/stride-2 max pool on a (rows, x*C) lane-packed tile via exact
        # one-hot selection matmuls (MXU has plenty of slack here).
        mw = jnp.maximum(jnp.dot(m, sw0, preferred_element_type=f32),
                         jnp.dot(m, sw1, preferred_element_type=f32))
        return jnp.maximum(jnp.dot(sh0, mw, preferred_element_type=f32),
                           jnp.dot(sh1, mw, preferred_element_type=f32))

    # Zero the H-padding rows of the conv2 input scratch once.
    zrow = jnp.zeros((1, LW2), f32)
    mp_ref[0:1, :] = zrow
    mp_ref[H2 + 1:H2 + 2, :] = zrow

    for n in range(N):                       # N=2, statically unrolled
        xpn = xp_ref[n]                      # (HP, WP*CIN) = (18, 72)

        # conv1 (3x3, pad=1) with bn1 scale folded into banded weights.
        acc = (jnp.dot(xpn[0:H, :], w1b_ref[0], preferred_element_type=f32)
               + jnp.dot(xpn[1:1 + H, :], w1b_ref[1], preferred_element_type=f32)
               + jnp.dot(xpn[2:2 + H, :], w1b_ref[2], preferred_element_type=f32))
        acc = acc + b1_ref[...]              # bn1 bias, (1, 128) broadcast
        main = jnp.maximum(pool2(acc), 0.0)  # pool1 then relu1 -> (8, 64)

        # shortcut: 1x1 conv + folded sbn, then spool.
        sh = jnp.dot(xpn[1:1 + H, :], wsb_ref[...],
                     preferred_element_type=f32) + sb_ref[...]
        short = pool2(sh)                    # (8, 64)

        # conv2 (3x3, pad=1) + bn2: H padding via zero-bordered VMEM scratch,
        # W padding folded into the banded weight matrices.
        mp_ref[1:1 + H2, :] = main
        acc2 = (jnp.dot(mp_ref[0:H2, :], w2b_ref[0], preferred_element_type=f32)
                + jnp.dot(mp_ref[1:1 + H2, :], w2b_ref[1], preferred_element_type=f32)
                + jnp.dot(mp_ref[2:2 + H2, :], w2b_ref[2], preferred_element_type=f32))
        acc2 = acc2 + b2_ref[...]            # bn2 bias, (1, 64) broadcast

        out_ref[n] = jnp.maximum(acc2 + short, 0.0)


# ---------------- glue (plain JAX wrapper) ----------------
def _bn_fold(gamma, beta, mean, var):
    scale = gamma / jnp.sqrt(var + EPS)
    bias = beta - mean * scale
    return scale, bias


def basic_block_forward(x_nchw, params):
    # --- activations: NCHW -> lane-packed padded rows (N, HP, WP*CIN) ---
    x_nhwc = jnp.transpose(x_nchw, (0, 2, 3, 1)).astype(jnp.float32)
    xp = jnp.pad(x_nhwc, ((0, 0), (PAD, PAD), (PAD, PAD), (0, 0)))
    xp = xp.reshape(N, HP, WPC)

    # --- fold BN into weights (constant-shaped trace-time prep) ---
    s1, b1 = _bn_fold(*params["bn1"])
    s2, b2 = _bn_fold(*params["bn2"])
    ss, sb = _bn_fold(*params["sbn"])

    w1s = params["w1"] * s1                         # (K,K,CIN,PLANES)
    w2s = params["w2"] * s2                         # (K,K,PLANES,PLANES)
    wss = params["ws"][0, 0] * ss                   # (CIN,PLANES)

    band1 = jnp.asarray(_BAND1)
    bands = jnp.asarray(_BANDS)
    band2 = jnp.asarray(_BAND2)

    # Banded (im2col-free) weight slabs: rows = padded input lanes, cols = out lanes.
    w1b = jnp.einsum("dab,ydio->yaibo", band1, w1s).reshape(K, WPC, LW)    # (3,72,128)
    wsb = jnp.einsum("ab,io->aibo", bands, wss).reshape(WPC, LW)           # (72,128)
    w2b = jnp.einsum("dab,ydio->yaibo", band2, w2s).reshape(K, LW2, LW2)   # (3,64,64)

    b1_lane = jnp.tile(b1, W).reshape(1, LW)        # (1,128)
    sb_lane = jnp.tile(sb, W).reshape(1, LW)        # (1,128)
    b2_lane = jnp.tile(b2, W2).reshape(1, LW2)      # (1,64)

    vmem = pl.BlockSpec(memory_space=pltpu.MemorySpace.VMEM)
    out_packed = pl.pallas_call(
        basic_block_kernel,
        out_shape=jax.ShapeDtypeStruct((N, H2, LW2), jnp.float32),
        in_specs=[vmem] * 11,
        out_specs=vmem,
        scratch_shapes=[pltpu.VMEM((H2 + 2, LW2), jnp.float32)],
    )(xp, w1b, wsb, w2b, b1_lane, sb_lane, b2_lane,
      jnp.asarray(_SW0), jnp.asarray(_SW1), jnp.asarray(_SH0), jnp.asarray(_SH1))

    # lane-packed (N, H2, W2*PLANES) -> NCHW (wrapper-side layout plumbing)
    out_nhwc = out_packed.reshape(N, H2, W2, PLANES)
    return jnp.transpose(out_nhwc, (0, 3, 1, 2))


# ---------------- deterministic parameters ----------------
def init_params(key):
    ks = jax.random.split(key, 6)

    def bn_params(k):
        k1, k2, k3, k4 = jax.random.split(k, 4)
        gamma = jax.random.uniform(k1, (PLANES,), minval=0.5, maxval=1.5)
        beta = jax.random.normal(k2, (PLANES,)) * 0.1
        mean = jax.random.normal(k3, (PLANES,)) * 0.1
        var = jax.random.uniform(k4, (PLANES,), minval=0.5, maxval=1.5)
        return (gamma, beta, mean, var)

    w1 = jax.random.normal(ks[0], (K, K, CIN, PLANES)) * (1.0 / (K * K * CIN) ** 0.5)
    w2 = jax.random.normal(ks[1], (K, K, PLANES, PLANES)) * (1.0 / (K * K * PLANES) ** 0.5)
    ws = jax.random.normal(ks[2], (1, 1, CIN, PLANES)) * (1.0 / CIN ** 0.5)
    return {
        "w1": w1.astype(jnp.float32),
        "w2": w2.astype(jnp.float32),
        "ws": ws.astype(jnp.float32),
        "bn1": bn_params(ks[3]),
        "bn2": bn_params(ks[4]),
        "sbn": bn_params(ks[5]),
    }


# ---------------- pure-JAX reference (for correctness check) ----------------
def ref_forward(x, params):
    def conv(x, w, pad):
        return lax.conv_general_dilated(
            x, w, window_strides=(1, 1), padding=[(pad, pad), (pad, pad)],
            dimension_numbers=("NCHW", "HWIO", "NCHW"),
            precision=lax.Precision.HIGHEST)

    def bn(x, p):
        gamma, beta, mean, var = p
        inv = gamma / jnp.sqrt(var + EPS)
        return x * inv[None, :, None, None] + (beta - mean * inv)[None, :, None, None]

    def pool(x, s):
        return lax.reduce_window(x, -jnp.inf, lax.max,
                                 (1, 1, s, s), (1, 1, s, s), "VALID")

    out = conv(x, params["w1"], PAD)
    out = bn(out, params["bn1"])
    out = pool(out, STRIDE)
    out = jnp.maximum(out, 0.0)
    out = conv(out, params["w2"], PAD)
    out = bn(out, params["bn2"])
    tmp = conv(x, params["ws"], 0)
    tmp = bn(tmp, params["sbn"])
    tmp = pool(tmp, STRIDE)
    return jnp.maximum(out + tmp, 0.0)


if __name__ == "__main__":
    key = jax.random.PRNGKey(0)
    kx, kp = jax.random.split(key)
    x = jax.random.normal(kx, (N, CIN, H, W), dtype=jnp.float32)
    params = init_params(kp)

    out = jax.jit(basic_block_forward)(x, params)
    out = jax.block_until_ready(out)

    assert out.shape == (N, PLANES, H2, W2), out.shape
    ref = ref_forward(x, params)
    max_err = float(jnp.max(jnp.abs(out - ref)))
    if not (max_err < 2e-2):
        raise AssertionError(f"Pallas output mismatch vs reference: max abs err {max_err}")

    print("KERNEL_OK")
</pallas_src>

<mosaic_0001>
module attributes {stable_mosaic.version = 11 : i64} {
  func.func @basic_block_kernel(%arg0: memref<2x18x72xf32, #tpu.memory_space<vmem>>, %arg1: memref<3x72x128xf32, #tpu.memory_space<vmem>>, %arg2: memref<72x128xf32, #tpu.memory_space<vmem>>, %arg3: memref<3x64x64xf32, #tpu.memory_space<vmem>>, %arg4: memref<1x128xf32, #tpu.memory_space<vmem>>, %arg5: memref<1x128xf32, #tpu.memory_space<vmem>>, %arg6: memref<1x64xf32, #tpu.memory_space<vmem>>, %arg7: memref<128x64xf32, #tpu.memory_space<vmem>>, %arg8: memref<128x64xf32, #tpu.memory_space<vmem>>, %arg9: memref<8x16xf32, #tpu.memory_space<vmem>>, %arg10: memref<8x16xf32, #tpu.memory_space<vmem>>, %arg11: memref<2x8x64xf32, #tpu.memory_space<vmem>>, %arg12: memref<10x64xf32, #tpu.memory_space<vmem>>) attributes {dimension_semantics = [], scalar_prefetch = 0 : i64, scratch_operands = 1 : i64, tpu.core_type = #tpu.core_type<tc>} {
    %c0 = arith.constant 0 : index
    %c0_0 = arith.constant 0 : index
    %0 = vector.load %arg7[%c0, %c0_0] : memref<128x64xf32, #tpu.memory_space<vmem>>, vector<128x64xf32>
    %c0_1 = arith.constant 0 : index
    %c0_2 = arith.constant 0 : index
    %1 = vector.load %arg8[%c0_1, %c0_2] : memref<128x64xf32, #tpu.memory_space<vmem>>, vector<128x64xf32>
    %c0_3 = arith.constant 0 : index
    %c0_4 = arith.constant 0 : index
    %2 = vector.load %arg9[%c0_3, %c0_4] : memref<8x16xf32, #tpu.memory_space<vmem>>, vector<8x16xf32>
    %c0_5 = arith.constant 0 : index
    %c0_6 = arith.constant 0 : index
    %3 = vector.load %arg10[%c0_5, %c0_6] : memref<8x16xf32, #tpu.memory_space<vmem>>, vector<8x16xf32>
    %cst = arith.constant 0.000000e+00 : f32
    %4 = vector.broadcast %cst : f32 to vector<1x64xf32>
    %c0_7 = arith.constant 0 : index
    %c0_8 = arith.constant 0 : index
    %5 = vector.load %arg12[%c0_7, %c0_8] : memref<10x64xf32, #tpu.memory_space<vmem>>, vector<1x64xf32>
    tpu.vector_store %arg12[%c0_7, %c0_8], %4 {strides = array<i32>} : memref<10x64xf32, #tpu.memory_space<vmem>>, vector<1x64xf32>,
    %c9 = arith.constant 9 : index
    %c0_9 = arith.constant 0 : index
    %6 = vector.load %arg12[%c9, %c0_9] : memref<10x64xf32, #tpu.memory_space<vmem>>, vector<1x64xf32>
    tpu.vector_store %arg12[%c9, %c0_9], %4 {strides = array<i32>} : memref<10x64xf32, #tpu.memory_space<vmem>>, vector<1x64xf32>,
    %c0_10 = arith.constant 0 : index
    %c0_11 = arith.constant 0 : index
    %c0_12 = arith.constant 0 : index
    %7 = vector.load %arg0[%c0_10, %c0_11, %c0_12] : memref<2x18x72xf32, #tpu.memory_space<vmem>>, vector<1x18x72xf32>
    %8 = vector.shape_cast %7 : vector<1x18x72xf32> to vector<18x72xf32>
    %9 = vector.extract_strided_slice %8 {offsets = [0, 0], sizes = [16, 72], strides = [1, 1]} : vector<18x72xf32> to vector<16x72xf32>
    %c0_13 = arith.constant 0 : index
    %c0_14 = arith.constant 0 : index
    %c0_15 = arith.constant 0 : index
    %10 = vector.load %arg1[%c0_13, %c0_14, %c0_15] : memref<3x72x128xf32, #tpu.memory_space<vmem>>, vector<1x72x128xf32>
    %11 = vector.shape_cast %10 : vector<1x72x128xf32> to vector<72x128xf32>
    %cst_16 = arith.constant dense<0.000000e+00> : vector<16x128xf32>
    %12 = tpu.matmul %9, %11, %cst_16 {dimension_numbers = #tpu.dot_dimension_numbers<[1], [0], [0], [1], [0, 0, 1, 1], [], []>} : vector<16x72xf32>, vector<72x128xf32>, vector<16x128xf32> -> vector<16x128xf32>
    %13 = vector.extract_strided_slice %8 {offsets = [1, 0], sizes = [16, 72], strides = [1, 1]} : vector<18x72xf32> to vector<16x72xf32>
    %c1 = arith.constant 1 : index
    %c0_17 = arith.constant 0 : index
    %c0_18 = arith.constant 0 : index
    %14 = vector.load %arg1[%c1, %c0_17, %c0_18] : memref<3x72x128xf32, #tpu.memory_space<vmem>>, vector<1x72x128xf32>
    %15 = vector.shape_cast %14 : vector<1x72x128xf32> to vector<72x128xf32>
    %cst_19 = arith.constant dense<0.000000e+00> : vector<16x128xf32>
    %16 = tpu.matmul %13, %15, %cst_19 {dimension_numbers = #tpu.dot_dimension_numbers<[1], [0], [0], [1], [0, 0, 1, 1], [], []>} : vector<16x72xf32>, vector<72x128xf32>, vector<16x128xf32> -> vector<16x128xf32>
    %17 = arith.addf %12, %16 : vector<16x128xf32>
    %18 = vector.extract_strided_slice %8 {offsets = [2, 0], sizes = [16, 72], strides = [1, 1]} : vector<18x72xf32> to vector<16x72xf32>
    %c2 = arith.constant 2 : index
    %c0_20 = arith.constant 0 : index
    %c0_21 = arith.constant 0 : index
    %19 = vector.load %arg1[%c2, %c0_20, %c0_21] : memref<3x72x128xf32, #tpu.memory_space<vmem>>, vector<1x72x128xf32>
    %20 = vector.shape_cast %19 : vector<1x72x128xf32> to vector<72x128xf32>
    %cst_22 = arith.constant dense<0.000000e+00> : vector<16x128xf32>
    %21 = tpu.matmul %18, %20, %cst_22 {dimension_numbers = #tpu.dot_dimension_numbers<[1], [0], [0], [1], [0, 0, 1, 1], [], []>} : vector<16x72xf32>, vector<72x128xf32>, vector<16x128xf32> -> vector<16x128xf32>
    %22 = arith.addf %17, %21 : vector<16x128xf32>
    %c0_23 = arith.constant 0 : index
    %c0_24 = arith.constant 0 : index
    %23 = vector.load %arg4[%c0_23, %c0_24] : memref<1x128xf32, #tpu.memory_space<vmem>>, vector<1x128xf32>
    %24 = vector.broadcast %23 : vector<1x128xf32> to vector<16x128xf32>
    %25 = arith.addf %22, %24 : vector<16x128xf32>
    %cst_25 = arith.constant dense<0.000000e+00> : vector<16x64xf32>
    %26 = tpu.matmul %25, %0, %cst_25 {dimension_numbers = #tpu.dot_dimension_numbers<[1], [0], [0], [1], [0, 0, 1, 1], [], []>} : vector<16x128xf32>, vector<128x64xf32>, vector<16x64xf32> -> vector<16x64xf32>
    %cst_26 = arith.constant dense<0.000000e+00> : vector<16x64xf32>
    %27 = tpu.matmul %25, %1, %cst_26 {dimension_numbers = #tpu.dot_dimension_numbers<[1], [0], [0], [1], [0, 0, 1, 1], [], []>} : vector<16x128xf32>, vector<128x64xf32>, vector<16x64xf32> -> vector<16x64xf32>
    %28 = arith.maximumf %26, %27 : vector<16x64xf32>
    %cst_27 = arith.constant dense<0.000000e+00> : vector<8x64xf32>
    %29 = tpu.matmul %2, %28, %cst_27 {dimension_numbers = #tpu.dot_dimension_numbers<[1], [0], [0], [1], [0, 0, 1, 1], [], []>} : vector<8x16xf32>, vector<16x64xf32>, vector<8x64xf32> -> vector<8x64xf32>
    %cst_28 = arith.constant dense<0.000000e+00> : vector<8x64xf32>
    %30 = tpu.matmul %3, %28, %cst_28 {dimension_numbers = #tpu.dot_dimension_numbers<[1], [0], [0], [1], [0, 0, 1, 1], [], []>} : vector<8x16xf32>, vector<16x64xf32>, vector<8x64xf32> -> vector<8x64xf32>
    %31 = arith.maximumf %29, %30 : vector<8x64xf32>
    %cst_29 = arith.constant 0.000000e+00 : f32
    %32 = vector.broadcast %cst_29 : f32 to vector<8x64xf32>
    %33 = arith.maximumf %31, %32 : vector<8x64xf32>
    %34 = vector.extract_strided_slice %8 {offsets = [1, 0], sizes = [16, 72], strides = [1, 1]} : vector<18x72xf32> to vector<16x72xf32>
    %c0_30 = arith.constant 0 : index
    %c0_31 = arith.constant 0 : index
    %35 = vector.load %arg2[%c0_30, %c0_31] : memref<72x128xf32, #tpu.memory_space<vmem>>, vector<72x128xf32>
    %cst_32 = arith.constant dense<0.000000e+00> : vector<16x128xf32>
    %36 = tpu.matmul %34, %35, %cst_32 {dimension_numbers = #tpu.dot_dimension_numbers<[1], [0], [0], [1], [0, 0, 1, 1], [], []>} : vector<16x72xf32>, vector<72x128xf32>, vector<16x128xf32> -> vector<16x128xf32>
    %c0_33 = arith.constant 0 : index
    %c0_34 = arith.constant 0 : index
    %37 = vector.load %arg5[%c0_33, %c0_34] : memref<1x128xf32, #tpu.memory_space<vmem>>, vector<1x128xf32>
    %38 = vector.broadcast %37 : vector<1x128xf32> to vector<16x128xf32>
    %39 = arith.addf %36, %38 : vector<16x128xf32>
    %cst_35 = arith.constant dense<0.000000e+00> : vector<16x64xf32>
    %40 = tpu.matmul %39, %0, %cst_35 {dimension_numbers = #tpu.dot_dimension_numbers<[1], [0], [0], [1], [0, 0, 1, 1], [], []>} : vector<16x128xf32>, vector<128x64xf32>, vector<16x64xf32> -> vector<16x64xf32>
    %cst_36 = arith.constant dense<0.000000e+00> : vector<16x64xf32>
    %41 = tpu.matmul %39, %1, %cst_36 {dimension_numbers = #tpu.dot_dimension_numbers<[1], [0], [0], [1], [0, 0, 1, 1], [], []>} : vector<16x128xf32>, vector<128x64xf32>, vector<16x64xf32> -> vector<16x64xf32>
    %42 = arith.maximumf %40, %41 : vector<16x64xf32>
    %cst_37 = arith.constant dense<0.000000e+00> : vector<8x64xf32>
    %43 = tpu.matmul %2, %42, %cst_37 {dimension_numbers = #tpu.dot_dimension_numbers<[1], [0], [0], [1], [0, 0, 1, 1], [], []>} : vector<8x16xf32>, vector<16x64xf32>, vector<8x64xf32> -> vector<8x64xf32>
    %cst_38 = arith.constant dense<0.000000e+00> : vector<8x64xf32>
    %44 = tpu.matmul %3, %42, %cst_38 {dimension_numbers = #tpu.dot_dimension_numbers<[1], [0], [0], [1], [0, 0, 1, 1], [], []>} : vector<8x16xf32>, vector<16x64xf32>, vector<8x64xf32> -> vector<8x64xf32>
    %45 = arith.maximumf %43, %44 : vector<8x64xf32>
    %c1_39 = arith.constant 1 : index
    %c0_40 = arith.constant 0 : index
    %46 = vector.load %arg12[%c1_39, %c0_40] : memref<10x64xf32, #tpu.memory_space<vmem>>, vector<8x64xf32>
    tpu.vector_store %arg12[%c1_39, %c0_40], %33 {strides = array<i32>} : memref<10x64xf32, #tpu.memory_space<vmem>>, vector<8x64xf32>,
    %c0_41 = arith.constant 0 : index
    %c0_42 = arith.constant 0 : index
    %47 = vector.load %arg12[%c0_41, %c0_42] : memref<10x64xf32, #tpu.memory_space<vmem>>, vector<8x64xf32>
    %c0_43 = arith.constant 0 : index
    %c0_44 = arith.constant 0 : index
    %c0_45 = arith.constant 0 : index
    %48 = vector.load %arg3[%c0_43, %c0_44, %c0_45] : memref<3x64x64xf32, #tpu.memory_space<vmem>>, vector<1x64x64xf32>
    %49 = vector.shape_cast %48 : vector<1x64x64xf32> to vector<64x64xf32>
    %cst_46 = arith.constant dense<0.000000e+00> : vector<8x64xf32>
    %50 = tpu.matmul %47, %49, %cst_46 {dimension_numbers = #tpu.dot_dimension_numbers<[1], [0], [0], [1], [0, 0, 1, 1], [], []>} : vector<8x64xf32>, vector<64x64xf32>, vector<8x64xf32> -> vector<8x64xf32>
    %c1_47 = arith.constant 1 : index
    %c0_48 = arith.constant 0 : index
    %51 = vector.load %arg12[%c1_47, %c0_48] : memref<10x64xf32, #tpu.memory_space<vmem>>, vector<8x64xf32>
    %c1_49 = arith.constant 1 : index
    %c0_50 = arith.constant 0 : index
    %c0_51 = arith.constant 0 : index
    %52 = vector.load %arg3[%c1_49, %c0_50, %c0_51] : memref<3x64x64xf32, #tpu.memory_space<vmem>>, vector<1x64x64xf32>
    %53 = vector.shape_cast %52 : vector<1x64x64xf32> to vector<64x64xf32>
    %cst_52 = arith.constant dense<0.000000e+00> : vector<8x64xf32>
    %54 = tpu.matmul %51, %53, %cst_52 {dimension_numbers = #tpu.dot_dimension_numbers<[1], [0], [0], [1], [0, 0, 1, 1], [], []>} : vector<8x64xf32>, vector<64x64xf32>, vector<8x64xf32> -> vector<8x64xf32>
    %55 = arith.addf %50, %54 : vector<8x64xf32>
    %c2_53 = arith.constant 2 : index
    %c0_54 = arith.constant 0 : index
    %56 = vector.load %arg12[%c2_53, %c0_54] : memref<10x64xf32, #tpu.memory_space<vmem>>, vector<8x64xf32>
    %c2_55 = arith.constant 2 : index
    %c0_56 = arith.constant 0 : index
    %c0_57 = arith.constant 0 : index
    %57 = vector.load %arg3[%c2_55, %c0_56, %c0_57] : memref<3x64x64xf32, #tpu.memory_space<vmem>>, vector<1x64x64xf32>
    %58 = vector.shape_cast %57 : vector<1x64x64xf32> to vector<64x64xf32>
    %cst_58 = arith.constant dense<0.000000e+00> : vector<8x64xf32>
    %59 = tpu.matmul %56, %58, %cst_58 {dimension_numbers = #tpu.dot_dimension_numbers<[1], [0], [0], [1], [0, 0, 1, 1], [], []>} : vector<8x64xf32>, vector<64x64xf32>, vector<8x64xf32> -> vector<8x64xf32>
    %60 = arith.addf %55, %59 : vector<8x64xf32>
    %c0_59 = arith.constant 0 : index
    %c0_60 = arith.constant 0 : index
    %61 = vector.load %arg6[%c0_59, %c0_60] : memref<1x64xf32, #tpu.memory_space<vmem>>, vector<1x64xf32>
    %62 = vector.broadcast %61 : vector<1x64xf32> to vector<8x64xf32>
    %63 = arith.addf %60, %62 : vector<8x64xf32>
    %64 = arith.addf %63, %45 : vector<8x64xf32>
    %cst_61 = arith.constant 0.000000e+00 : f32
    %65 = vector.broadcast %cst_61 : f32 to vector<8x64xf32>
    %66 = arith.maximumf %64, %65 : vector<8x64xf32>
    %c0_62 = arith.constant 0 : index
    %c0_63 = arith.constant 0 : index
    %c0_64 = arith.constant 0 : index
    %67 = vector.load %arg11[%c0_62, %c0_63, %c0_64] : memref<2x8x64xf32, #tpu.memory_space<vmem>>, vector<1x8x64xf32>
    %68 = vector.shape_cast %67 : vector<1x8x64xf32> to vector<8x64xf32>
    %69 = vector.shape_cast %66 : vector<8x64xf32> to vector<1x8x64xf32>
    tpu.vector_store %arg11[%c0_62, %c0_63, %c0_64], %69 {strides = array<i32>} : memref<2x8x64xf32, #tpu.memory_space<vmem>>, vector<1x8x64xf32>,
    %c1_65 = arith.constant 1 : index
    %c0_66 = arith.constant 0 : index
    %c0_67 = arith.constant 0 : index
    %70 = vector.load %arg0[%c1_65, %c0_66, %c0_67] : memref<2x18x72xf32, #tpu.memory_space<vmem>>, vector<1x18x72xf32>
    %71 = vector.shape_cast %70 : vector<1x18x72xf32> to vector<18x72xf32>
    %72 = vector.extract_strided_slice %71 {offsets = [0, 0], sizes = [16, 72], strides = [1, 1]} : vector<18x72xf32> to vector<16x72xf32>
    %c0_68 = arith.constant 0 : index
    %c0_69 = arith.constant 0 : index
    %c0_70 = arith.constant 0 : index
    %73 = vector.load %arg1[%c0_68, %c0_69, %c0_70] : memref<3x72x128xf32, #tpu.memory_space<vmem>>, vector<1x72x128xf32>
    %74 = vector.shape_cast %73 : vector<1x72x128xf32> to vector<72x128xf32>
    %cst_71 = arith.constant dense<0.000000e+00> : vector<16x128xf32>
    %75 = tpu.matmul %72, %74, %cst_71 {dimension_numbers = #tpu.dot_dimension_numbers<[1], [0], [0], [1], [0, 0, 1, 1], [], []>} : vector<16x72xf32>, vector<72x128xf32>, vector<16x128xf32> -> vector<16x128xf32>
    %76 = vector.extract_strided_slice %71 {offsets = [1, 0], sizes = [16, 72], strides = [1, 1]} : vector<18x72xf32> to vector<16x72xf32>
    %c1_72 = arith.constant 1 : index
    %c0_73 = arith.constant 0 : index
    %c0_74 = arith.constant 0 : index
    %77 = vector.load %arg1[%c1_72, %c0_73, %c0_74] : memref<3x72x128xf32, #tpu.memory_space<vmem>>, vector<1x72x128xf32>
    %78 = vector.shape_cast %77 : vector<1x72x128xf32> to vector<72x128xf32>
    %cst_75 = arith.constant dense<0.000000e+00> : vector<16x128xf32>
    %79 = tpu.matmul %76, %78, %cst_75 {dimension_numbers = #tpu.dot_dimension_numbers<[1], [0], [0], [1], [0, 0, 1, 1], [], []>} : vector<16x72xf32>, vector<72x128xf32>, vector<16x128xf32> -> vector<16x128xf32>
    %80 = arith.addf %75, %79 : vector<16x128xf32>
    %81 = vector.extract_strided_slice %71 {offsets = [2, 0], sizes = [16, 72], strides = [1, 1]} : vector<18x72xf32> to vector<16x72xf32>
    %c2_76 = arith.constant 2 : index
    %c0_77 = arith.constant 0 : index
    %c0_78 = arith.constant 0 : index
    %82 = vector.load %arg1[%c2_76, %c0_77, %c0_78] : memref<3x72x128xf32, #tpu.memory_space<vmem>>, vector<1x72x128xf32>
    %83 = vector.shape_cast %82 : vector<1x72x128xf32> to vector<72x128xf32>
    %cst_79 = arith.constant dense<0.000000e+00> : vector<16x128xf32>
    %84 = tpu.matmul %81, %83, %cst_79 {dimension_numbers = #tpu.dot_dimension_numbers<[1], [0], [0], [1], [0, 0, 1, 1], [], []>} : vector<16x72xf32>, vector<72x128xf32>, vector<16x128xf32> -> vector<16x128xf32>
    %85 = arith.addf %80, %84 : vector<16x128xf32>
    %c0_80 = arith.constant 0 : index
    %c0_81 = arith.constant 0 : index
    %86 = vector.load %arg4[%c0_80, %c0_81] : memref<1x128xf32, #tpu.memory_space<vmem>>, vector<1x128xf32>
    %87 = vector.broadcast %86 : vector<1x128xf32> to vector<16x128xf32>
    %88 = arith.addf %85, %87 : vector<16x128xf32>
    %cst_82 = arith.constant dense<0.000000e+00> : vector<16x64xf32>
    %89 = tpu.matmul %88, %0, %cst_82 {dimension_numbers = #tpu.dot_dimension_numbers<[1], [0], [0], [1], [0, 0, 1, 1], [], []>} : vector<16x128xf32>, vector<128x64xf32>, vector<16x64xf32> -> vector<16x64xf32>
    %cst_83 = arith.constant dense<0.000000e+00> : vector<16x64xf32>
    %90 = tpu.matmul %88, %1, %cst_83 {dimension_numbers = #tpu.dot_dimension_numbers<[1], [0], [0], [1], [0, 0, 1, 1], [], []>} : vector<16x128xf32>, vector<128x64xf32>, vector<16x64xf32> -> vector<16x64xf32>
    %91 = arith.maximumf %89, %90 : vector<16x64xf32>
    %cst_84 = arith.constant dense<0.000000e+00> : vector<8x64xf32>
    %92 = tpu.matmul %2, %91, %cst_84 {dimension_numbers = #tpu.dot_dimension_numbers<[1], [0], [0], [1], [0, 0, 1, 1], [], []>} : vector<8x16xf32>, vector<16x64xf32>, vector<8x64xf32> -> vector<8x64xf32>
    %cst_85 = arith.constant dense<0.000000e+00> : vector<8x64xf32>
    %93 = tpu.matmul %3, %91, %cst_85 {dimension_numbers = #tpu.dot_dimension_numbers<[1], [0], [0], [1], [0, 0, 1, 1], [], []>} : vector<8x16xf32>, vector<16x64xf32>, vector<8x64xf32> -> vector<8x64xf32>
    %94 = arith.maximumf %92, %93 : vector<8x64xf32>
    %cst_86 = arith.constant 0.000000e+00 : f32
    %95 = vector.broadcast %cst_86 : f32 to vector<8x64xf32>
    %96 = arith.maximumf %94, %95 : vector<8x64xf32>
    %97 = vector.extract_strided_slice %71 {offsets = [1, 0], sizes = [16, 72], strides = [1, 1]} : vector<18x72xf32> to vector<16x72xf32>
    %c0_87 = arith.constant 0 : index
    %c0_88 = arith.constant 0 : index
    %98 = vector.load %arg2[%c0_87, %c0_88] : memref<72x128xf32, #tpu.memory_space<vmem>>, vector<72x128xf32>
    %cst_89 = arith.constant dense<0.000000e+00> : vector<16x128xf32>
    %99 = tpu.matmul %97, %98, %cst_89 {dimension_numbers = #tpu.dot_dimension_numbers<[1], [0], [0], [1], [0, 0, 1, 1], [], []>} : vector<16x72xf32>, vector<72x128xf32>, vector<16x128xf32> -> vector<16x128xf32>
    %c0_90 = arith.constant 0 : index
    %c0_91 = arith.constant 0 : index
    %100 = vector.load %arg5[%c0_90, %c0_91] : memref<1x128xf32, #tpu.memory_space<vmem>>, vector<1x128xf32>
    %101 = vector.broadcast %100 : vector<1x128xf32> to vector<16x128xf32>
    %102 = arith.addf %99, %101 : vector<16x128xf32>
    %cst_92 = arith.constant dense<0.000000e+00> : vector<16x64xf32>
    %103 = tpu.matmul %102, %0, %cst_92 {dimension_numbers = #tpu.dot_dimension_numbers<[1], [0], [0], [1], [0, 0, 1, 1], [], []>} : vector<16x128xf32>, vector<128x64xf32>, vector<16x64xf32> -> vector<16x64xf32>
    %cst_93 = arith.constant dense<0.000000e+00> : vector<16x64xf32>
    %104 = tpu.matmul %102, %1, %cst_93 {dimension_numbers = #tpu.dot_dimension_numbers<[1], [0], [0], [1], [0, 0, 1, 1], [], []>} : vector<16x128xf32>, vector<128x64xf32>, vector<16x64xf32> -> vector<16x64xf32>
    %105 = arith.maximumf %103, %104 : vector<16x64xf32>
    %cst_94 = arith.constant dense<0.000000e+00> : vector<8x64xf32>
    %106 = tpu.matmul %2, %105, %cst_94 {dimension_numbers = #tpu.dot_dimension_numbers<[1], [0], [0], [1], [0, 0, 1, 1], [], []>} : vector<8x16xf32>, vector<16x64xf32>, vector<8x64xf32> -> vector<8x64xf32>
    %cst_95 = arith.constant dense<0.000000e+00> : vector<8x64xf32>
    %107 = tpu.matmul %3, %105, %cst_95 {dimension_numbers = #tpu.dot_dimension_numbers<[1], [0], [0], [1], [0, 0, 1, 1], [], []>} : vector<8x16xf32>, vector<16x64xf32>, vector<8x64xf32> -> vector<8x64xf32>
    %108 = arith.maximumf %106, %107 : vector<8x64xf32>
    %c1_96 = arith.constant 1 : index
    %c0_97 = arith.constant 0 : index
    %109 = vector.load %arg12[%c1_96, %c0_97] : memref<10x64xf32, #tpu.memory_space<vmem>>, vector<8x64xf32>
    tpu.vector_store %arg12[%c1_96, %c0_97], %96 {strides = array<i32>} : memref<10x64xf32, #tpu.memory_space<vmem>>, vector<8x64xf32>,
    %c0_98 = arith.constant 0 : index
    %c0_99 = arith.constant 0 : index
    %110 = vector.load %arg12[%c0_98, %c0_99] : memref<10x64xf32, #tpu.memory_space<vmem>>, vector<8x64xf32>
    %c0_100 = arith.constant 0 : index
    %c0_101 = arith.constant 0 : index
    %c0_102 = arith.constant 0 : index
    %111 = vector.load %arg3[%c0_100, %c0_101, %c0_102] : memref<3x64x64xf32, #tpu.memory_space<vmem>>, vector<1x64x64xf32>
    %112 = vector.shape_cast %111 : vector<1x64x64xf32> to vector<64x64xf32>
    %cst_103 = arith.constant dense<0.000000e+00> : vector<8x64xf32>
    %113 = tpu.matmul %110, %112, %cst_103 {dimension_numbers = #tpu.dot_dimension_numbers<[1], [0], [0], [1], [0, 0, 1, 1], [], []>} : vector<8x64xf32>, vector<64x64xf32>, vector<8x64xf32> -> vector<8x64xf32>
    %c1_104 = arith.constant 1 : index
    %c0_105 = arith.constant 0 : index
    %114 = vector.load %arg12[%c1_104, %c0_105] : memref<10x64xf32, #tpu.memory_space<vmem>>, vector<8x64xf32>
    %c1_106 = arith.constant 1 : index
    %c0_107 = arith.constant 0 : index
    %c0_108 = arith.constant 0 : index
    %115 = vector.load %arg3[%c1_106, %c0_107, %c0_108] : memref<3x64x64xf32, #tpu.memory_space<vmem>>, vector<1x64x64xf32>
    %116 = vector.shape_cast %115 : vector<1x64x64xf32> to vector<64x64xf32>
    %cst_109 = arith.constant dense<0.000000e+00> : vector<8x64xf32>
    %117 = tpu.matmul %114, %116, %cst_109 {dimension_numbers = #tpu.dot_dimension_numbers<[1], [0], [0], [1], [0, 0, 1, 1], [], []>} : vector<8x64xf32>, vector<64x64xf32>, vector<8x64xf32> -> vector<8x64xf32>
    %118 = arith.addf %113, %117 : vector<8x64xf32>
    %c2_110 = arith.constant 2 : index
    %c0_111 = arith.constant 0 : index
    %119 = vector.load %arg12[%c2_110, %c0_111] : memref<10x64xf32, #tpu.memory_space<vmem>>, vector<8x64xf32>
    %c2_112 = arith.constant 2 : index
    %c0_113 = arith.constant 0 : index
    %c0_114 = arith.constant 0 : index
    %120 = vector.load %arg3[%c2_112, %c0_113, %c0_114] : memref<3x64x64xf32, #tpu.memory_space<vmem>>, vector<1x64x64xf32>
    %121 = vector.shape_cast %120 : vector<1x64x64xf32> to vector<64x64xf32>
    %cst_115 = arith.constant dense<0.000000e+00> : vector<8x64xf32>
    %122 = tpu.matmul %119, %121, %cst_115 {dimension_numbers = #tpu.dot_dimension_numbers<[1], [0], [0], [1], [0, 0, 1, 1], [], []>} : vector<8x64xf32>, vector<64x64xf32>, vector<8x64xf32> -> vector<8x64xf32>
    %123 = arith.addf %118, %122 : vector<8x64xf32>
    %c0_116 = arith.constant 0 : index
    %c0_117 = arith.constant 0 : index
    %124 = vector.load %arg6[%c0_116, %c0_117] : memref<1x64xf32, #tpu.memory_space<vmem>>, vector<1x64xf32>
    %125 = vector.broadcast %124 : vector<1x64xf32> to vector<8x64xf32>
    %126 = arith.addf %123, %125 : vector<8x64xf32>
    %127 = arith.addf %126, %108 : vector<8x64xf32>
    %cst_118 = arith.constant 0.000000e+00 : f32
    %128 = vector.broadcast %cst_118 : f32 to vector<8x64xf32>
    %129 = arith.maximumf %127, %128 : vector<8x64xf32>
    %c1_119 = arith.constant 1 : index
    %c0_120 = arith.constant 0 : index
    %c0_121 = arith.constant 0 : index
    %130 = vector.load %arg11[%c1_119, %c0_120, %c0_121] : memref<2x8x64xf32, #tpu.memory_space<vmem>>, vector<1x8x64xf32>
    %131 = vector.shape_cast %130 : vector<1x8x64xf32> to vector<8x64xf32>
    %132 = vector.shape_cast %129 : vector<8x64xf32> to vector<1x8x64xf32>
    tpu.vector_store %arg11[%c1_119, %c0_120, %c0_121], %132 {strides = array<i32>} : memref<2x8x64xf32, #tpu.memory_space<vmem>>, vector<1x8x64xf32>,
    return
  }
}

</mosaic_0001>

<bundles_post_ra>
// kernel: tile.18
= control target key start
LH: loop header
LB: loop body
LE: loop exit
PB: predicated region body
PF: predicated region fallthrough
CT: control target
= control target key end

     0   :  { %s28_s0 = inlined_call_operand.vmem [shape: f32[8], index: 0, kind: input, shape index: {}]   ;;  %s29_s1 = inlined_call_operand.vmem [shape: f32[16,8], index: 1, kind: output, shape index: {}]  }
   0x1   :  { %v4_v0 = vld [vmem:[%s28_s0] ss:$0 sm:$0xff] }
   0x2   :  { %5 = vst [vmem:[%s29_s1] sm:$0xff] %v4_v0  ;;  %8 = vst [vmem:[%s29_s1 + $0x8] sm:$0xff] %v4_v0 }

// kernel: tile.19
= control target key start
LH: loop header
LB: loop body
LE: loop exit
PB: predicated region body
PF: predicated region fallthrough
CT: control target
= control target key end

     0   :  { %s131_s10 = smov 120   ;;  %s132_s11 = smov 104   ;;  %vm3_vm0 = vcmask 64512   ;;  %vm9_vm1 = vcmask 1048512   ;;  %vm15_vm2 = vcmask 982912   ;;  %vm21_vm3 = vcmask 917312   ;;  %s207_s0 = inlined_call_operand.vmem [shape: f32[16,8], index: 0, kind: input, shape index: {}]   ;;  %s208_s1 = inlined_call_operand.vmem [shape: f32[1,128], index: 1, kind: output, shape index: {}]  }
   0x1   :  { %v101_v0 = vld [vmem:[%s207_s0 + $0xf] sm:$0x1]   ;;  %v103_v1 = vld [vmem:[%s207_s0 + $0xd] sm:$0x1]   ;;  %v102_v2 = vld [vmem:[%s207_s0 + $0xe] sm:$0x1]  }
   0x2   :  { %7 = vrot.lane.b32.xlu0 %v101_v0, %s131_s10  ;;  %19 = vrot.lane.b32.xlu1 %v103_v1, %s132_s11  ;;  %v104_v3 = vld [vmem:[%s207_s0 + $0xc] sm:$0x1]   ;;  %s133_s16 = smov 112   ;;  %s134_s17 = smov 96   ;;  %v105_v4 = vld [vmem:[%s207_s0 + $0xb] sm:$0x1]  }
   0x3   :  { %v106_v5 = vld [vmem:[%s207_s0 + $0xa] sm:$0x1]   ;;  %v2_v6 = vld [vmem:[%s207_s0] sm:$0x1]   ;;  %s135_s24 = smov 88   ;;  %s136_s25 = smov 80  }
   0x4   :  { %4 = vst.msk [vmem:[#allocation0] sm:$0x1] %vm3_vm0, %v2_v6   ;;  %v107_v7 = vld [vmem:[%s207_s0 + $0x9] sm:$0x1]   ;;  %v108_v8 = vld [vmem:[%s207_s0 + $0x8] sm:$0x1]  }
   0x5   :  { %s137_s30 = smov 72   ;;  %s138_s2 = smov 64   ;;  %v109_v9 = vld [vmem:[%s207_s0 + $0x7] sm:$0x1]   ;;  %v110_v10 = vld [vmem:[%s207_s0 + $0x6] sm:$0x1]  }
   0x6   :  { %13 = vrot.lane.b32.xlu0 %v102_v2, %s133_s16  ;;  %25 = vrot.lane.b32.xlu1 %v104_v3, %s134_s17  ;;  %s139_s7 = smov 56   ;;  %s140_s8 = smov 48   ;;  %v111_v11 = vld [vmem:[%s207_s0 + $0x5] sm:$0x1]   ;;  %v112_v12 = vld [vmem:[%s207_s0 + $0x4] sm:$0x1]  }
   0x7   :  { %s141_s13 = smov 40   ;;  %s142_s14 = smov 32   ;;  %v113_v13 = vld [vmem:[%s207_s0 + $0x3] sm:$0x1]   ;;  %v114_v14 = vld [vmem:[%s207_s0 + $0x2] sm:$0x1]  }
   0x8   :  { %s143_s19 = smov 24   ;;  %s144_s20 = smov 16   ;;  %v115_v15 = vld [vmem:[%s207_s0 + $0x1] sm:$0x1]   ;;  %vm27_vm4 = vcmask 851712   ;;  %vm33_vm5 = vcmask 786112  }
   0x9   :  { %s145_s0 = smov 8   ;;  %vm39_vm6 = vcmask 720512   ;;  %vm45_vm7 = vcmask 654912   ;;  %vm51_vm8 = vcmask 589312   ;;  %vm57_vm9 = vcmask 523712  }
   0xa   :  { %31 = vrot.lane.b32.xlu0 %v105_v4, %s135_s24  ;;  %37 = vrot.lane.b32.xlu1 %v106_v5, %s136_s25  ;;  %vm63_vm10 = vcmask 458112   ;;  %vm69_vm11 = vcmask 392512   ;;  %vm75_vm12 = vcmask 326912   ;;  %vm81_vm13 = vcmask 261312  }
   0xb   :  { %vm87_vm14 = vcmask 195712   ;;  %vm93_vm15 = vcmask 130112  }
   0xe   :  { %43 = vrot.lane.b32.xlu0 %v107_v7, %s137_s30  ;;  %49 = vrot.lane.b32.xlu1 %v108_v8, %s138_s2 }
  0x12   :  { %55 = vrot.lane.b32.xlu0 %v109_v9, %s139_s7  ;;  %61 = vrot.lane.b32.xlu1 %v110_v10, %s140_s8 }
  0x16   :  { %67 = vrot.lane.b32.xlu0 %v111_v11, %s141_s13  ;;  %73 = vrot.lane.b32.xlu1 %v112_v12, %s142_s14 }
  0x1a   :  { %79 = vrot.lane.b32.xlu0 %v113_v13, %s143_s19  ;;  %85 = vrot.lane.b32.xlu1 %v114_v14, %s144_s20 }
  0x1e   :  { %91 = vrot.lane.b32.xlu0 %v115_v15, %s145_s0 }
  0x74   :  { %v8_v16 = vpop.permute.xlu0 %7   ;;  %v20_v17 = vpop.permute.xlu1 %19  }
  0x75   :  { %10 = vst.msk [vmem:[#allocation0] sm:$0x1] %vm9_vm1, %v8_v16  }
  0x78   :  { %v14_v18 = vpop.permute.xlu0 %13   ;;  %v26_v19 = vpop.permute.xlu1 %25  }
  0x79   :  { %16 = vst.msk [vmem:[#allocation0] sm:$0x1] %vm15_vm2, %v14_v18  }
  0x7a   :  { %22 = vst.msk [vmem:[#allocation0] sm:$0x1] %vm21_vm3, %v20_v17  }
  0x7b   :  { %28 = vst.msk [vmem:[#allocation0] sm:$0x1] %vm27_vm4, %v26_v19  }
  0x7c   :  { %v32_v20 = vpop.permute.xlu0 %31   ;;  %v38_v21 = vpop.permute.xlu1 %37  }
  0x7d   :  { %34 = vst.msk [vmem:[#allocation0] sm:$0x1] %vm33_vm5, %v32_v20  }
  0x7e   :  { %40 = vst.msk [vmem:[#allocation0] sm:$0x1] %vm39_vm6, %v38_v21  }
  0x80   :  { %v44_v22 = vpop.permute.xlu0 %43   ;;  %v50_v23 = vpop.permute.xlu1 %49  }
  0x81   :  { %46 = vst.msk [vmem:[#allocation0] sm:$0x1] %vm45_vm7, %v44_v22  }
  0x82   :  { %52 = vst.msk [vmem:[#allocation0] sm:$0x1] %vm51_vm8, %v50_v23  }
  0x84   :  { %v56_v24 = vpop.permute.xlu0 %55   ;;  %v62_v25 = vpop.permute.xlu1 %61  }
  0x85   :  { %58 = vst.msk [vmem:[#allocation0] sm:$0x1] %vm57_vm9, %v56_v24  }
  0x86   :  { %64 = vst.msk [vmem:[#allocation0] sm:$0x1] %vm63_vm10, %v62_v25  }
  0x88   :  { %v68_v26 = vpop.permute.xlu0 %67   ;;  %v74_v27 = vpop.permute.xlu1 %73  }
  0x89   :  { %70 = vst.msk [vmem:[#allocation0] sm:$0x1] %vm69_vm11, %v68_v26  }
  0x8a   :  { %76 = vst.msk [vmem:[#allocation0] sm:$0x1] %vm75_vm12, %v74_v27  }
  0x8c   :  { %v80_v28 = vpop.permute.xlu0 %79   ;;  %v86_v29 = vpop.permute.xlu1 %85  }
  0x8d   :  { %82 = vst.msk [vmem:[#allocation0] sm:$0x1] %vm81_vm13, %v80_v28  }
  0x8e   :  { %88 = vst.msk [vmem:[#allocation0] sm:$0x1] %vm87_vm14, %v86_v29  }
  0x90   :  { %v92_v30 = vpop.permute.xlu0 %91  }
  0x91   :  { %94 = vst.msk [vmem:[#allocation0] sm:$0x1] %vm93_vm15, %v92_v30  }
  0x98   :  { %v98_v31 = vld [vmem:[#allocation0] sm:$0x1] }
  0x99   :  { %100 = vst [vmem:[%s208_s1] sm:$0x1] %v98_v31 }

// kernel: tile.28
= control target key start
LH: loop header
LB: loop body
LE: loop exit
PB: predicated region body
PF: predicated region fallthrough
CT: control target
= control target key end

     0   :  { %s22_s0 = inlined_call_operand.vmem [shape: f32[8], index: 0, kind: input, shape index: {}]   ;;  %s23_s1 = inlined_call_operand.vmem [shape: f32[8,8], index: 1, kind: output, shape index: {}]  }
   0x1   :  { %v4_v0 = vld [vmem:[%s22_s0] ss:$0 sm:$0xff] }
   0x2   :  { %5 = vst [vmem:[%s23_s1] sm:$0xff] %v4_v0 }

// kernel: tile.29
= control target key start
LH: loop header
LB: loop body
LE: loop exit
PB: predicated region body
PF: predicated region fallthrough
CT: control target
= control target key end

     0   :  { %s67_s10 = smov 56   ;;  %s68_s11 = smov 40   ;;  %vm3_vm0 = vcmask 64512   ;;  %vm9_vm1 = vcmask 523712   ;;  %vm15_vm2 = vcmask 458112   ;;  %vm21_vm3 = vcmask 392512   ;;  %s111_s0 = inlined_call_operand.vmem [shape: f32[8,8], index: 0, kind: input, shape index: {}]   ;;  %s112_s1 = inlined_call_operand.vmem [shape: f32[1,64], index: 1, kind: output, shape index: {}]  }
   0x1   :  { %v53_v0 = vld [vmem:[%s111_s0 + $0x7] sm:$0x1]   ;;  %v55_v1 = vld [vmem:[%s111_s0 + $0x5] sm:$0x1]   ;;  %v54_v2 = vld [vmem:[%s111_s0 + $0x6] sm:$0x1]  }
   0x2   :  { %7 = vrot.lane.b32.xlu0 %v53_v0, %s67_s10  ;;  %19 = vrot.lane.b32.xlu1 %v55_v1, %s68_s11  ;;  %v56_v3 = vld [vmem:[%s111_s0 + $0x4] sm:$0x1]   ;;  %v2_v4 = vld [vmem:[%s111_s0] sm:$0x1]   ;;  %s69_s18 = smov 48   ;;  %s70_s19 = smov 32  }
   0x3   :  { %4 = vst.msk [vmem:[#allocation0] sm:$0x1] %vm3_vm0, %v2_v4   ;;  %v57_v5 = vld [vmem:[%s111_s0 + $0x3] sm:$0x1]   ;;  %v58_v6 = vld [vmem:[%s111_s0 + $0x2] sm:$0x1]  }
   0x4   :  { %s71_s24 = smov 24   ;;  %s72_s25 = smov 16   ;;  %v59_v7 = vld [vmem:[%s111_s0 + $0x1] sm:$0x1]   ;;  %vm27_vm4 = vcmask 326912   ;;  %vm33_vm5 = vcmask 261312  }
   0x5   :  { %s73_s0 = smov 8   ;;  %vm39_vm6 = vcmask 195712   ;;  %vm45_vm7 = vcmask 130112  }
   0x6   :  { %13 = vrot.lane.b32.xlu0 %v54_v2, %s69_s18  ;;  %25 = vrot.lane.b32.xlu1 %v56_v3, %s70_s19 }
   0xa   :  { %31 = vrot.lane.b32.xlu0 %v57_v5, %s71_s24  ;;  %37 = vrot.lane.b32.xlu1 %v58_v6, %s72_s25 }
   0xe   :  { %43 = vrot.lane.b32.xlu0 %v59_v7, %s73_s0 }
  0x74   :  { %v8_v8 = vpop.permute.xlu0 %7   ;;  %v20_v9 = vpop.permute.xlu1 %19  }
  0x75   :  { %10 = vst.msk [vmem:[#allocation0] sm:$0x1] %vm9_vm1, %v8_v8  }
  0x78   :  { %v14_v10 = vpop.permute.xlu0 %13   ;;  %v26_v11 = vpop.permute.xlu1 %25  }
  0x79   :  { %16 = vst.msk [vmem:[#allocation0] sm:$0x1] %vm15_vm2, %v14_v10  }
  0x7a   :  { %22 = vst.msk [vmem:[#allocation0] sm:$0x1] %vm21_vm3, %v20_v9  }
  0x7b   :  { %28 = vst.msk [vmem:[#allocation0] sm:$0x1] %vm27_vm4, %v26_v11  }
  0x7c   :  { %v32_v12 = vpop.permute.xlu0 %31   ;;  %v38_v13 = vpop.permute.xlu1 %37  }
  0x7d   :  { %34 = vst.msk [vmem:[#allocation0] sm:$0x1] %vm33_vm5, %v32_v12  }
  0x7e   :  { %40 = vst.msk [vmem:[#allocation0] sm:$0x1] %vm39_vm6, %v38_v13  }
  0x80   :  { %v44_v14 = vpop.permute.xlu0 %43  }
  0x81   :  { %46 = vst.msk [vmem:[#allocation0] sm:$0x1] %vm45_vm7, %v44_v14  }
  0x88   :  { %v50_v15 = vld [vmem:[#allocation0] sm:$0x1] }
  0x89   :  { %52 = vst [vmem:[%s112_s1] sm:$0x1] %v50_v15 }

// kernel: basic_block_forward.1
= control target key start
LH: loop header
LB: loop body
LE: loop exit
PB: predicated region body
PF: predicated region fallthrough
CT: control target
= control target key end

     0   :  { %vm100_vm0 = vcmask 1046528   ;;  %vm106_vm1 = vcmask 588800   ;;  %vm275_vm2 = vcmask 1045504   ;;  %vm4080_vm3 = vmmov 0   ;;  %s4956_s1 = inlined_call_operand.vmem [shape: f32[3,72,128], index: 1, kind: input, shape index: {}]   ;;  %s4957_s0 = inlined_call_operand.vmem [shape: f32[2,18,72], index: 0, kind: input, shape index: {}]   ;;  %s4958_s7 = inlined_call_operand.vmem [shape: f32[128,64], index: 7, kind: input, shape index: {}]   ;;  %s4959_s8 = inlined_call_operand.vmem [shape: f32[128,64], index: 8, kind: input, shape index: {}]   ;;  %s4960_s2 = inlined_call_operand.vmem [shape: f32[72,128], index: 2, kind: input, shape index: {}]   ;;  %s4961_s4 = inlined_call_operand.vmem [shape: f32[1,128], index: 4, kind: input, shape index: {}]   ;;  %s4962_s5 = inlined_call_operand.vmem [shape: f32[1,128], index: 5, kind: input, shape index: {}]   ;;  %s4963_s9 = inlined_call_operand.vmem [shape: f32[8,16], index: 9, kind: input, shape index: {}]   ;;  %s4964_s10 = inlined_call_operand.vmem [shape: f32[8,16], index: 10, kind: input, shape index: {}]   ;;  %s4965_s3 = inlined_call_operand.vmem [shape: f32[3,64,64], index: 3, kind: input, shape index: {}]   ;;  %s4966_s6 = inlined_call_operand.vmem [shape: f32[1,64], index: 6, kind: input, shape index: {}]   ;;  %s4967_s11 = inlined_call_operand.vmem [shape: f32[2,8,64], index: 11, kind: output, shape index: {}]  }
   0x1   :  { %v2552_v0 = vld [vmem:[%s4956_s1 + $0x48] sm:$0xff]  ;;  %v2553_v1 = vld [vmem:[%s4956_s1 + $0x50] sm:$0xff]  ;;  %v2554_v2 = vld [vmem:[%s4956_s1 + $0x58] sm:$0xff]  ;;  %vm523_vm4 = vcmask 130048   ;;  %vm72_vm5 = vcmask 516096   ;;  %vm1056_vm6 = vcmask 523264  }
   0x2   :  { %v4151_v3 = vpack.c.bf16 %v2553_v1, %v2552_v0  ;;  %v2555_v4 = vld [vmem:[%s4956_s1 + $0x60] sm:$0xff]  ;;  %v2556_v6 = vld [vmem:[%s4956_s1 + $0x68] sm:$0xff]  ;;  %v2557_v7 = vld [vmem:[%s4956_s1 + $0x70] sm:$0xff] }
   0x3   :  { %v4156_v5 = vpack.c.bf16 %v2555_v4, %v2554_v2  ;;  %v4168_v8 = vld [vmem:[%s4957_s0] sm:$0xff]  ;;  %v4173_v9 = vld [vmem:[%s4957_s0 + $0x8] sm:$0xff]  ;;  %v4179_v12 = vpack.c.bf16 %v2557_v7, %v2556_v6  ;;  %v2558_v13 = vld [vmem:[%s4956_s1 + $0x78] sm:$0xff] }
   0x4   :  { %3589 = vmatprep.subr.bf16.mxu0 %v4151_v3  ;;  %v101_v10 = vrot.slane %v4168_v8, 1  ;;  %v102_v11 = vrot.slane %v4173_v9, 1  ;;  %v2559_v14 = vld [vmem:[%s4956_s1 + $0x80] sm:$0xff]  ;;  %v39_v18 = vld [vmem:[%s4958_s7 + $0x8] sm:$0xff]  ;;  %v40_v19 = vld [vmem:[%s4958_s7 + $0x10] sm:$0xff]  ;;  %v276_v57 = vrot.slane %v4168_v8, 2 }
   0x5   :  { %3591 = vmatpush3.bf16.msra.mxu0 %v4151_v3  ;;  %v4194_v16 = vpack.c.bf16 %v2559_v14, %v2558_v13  ;;  %v38_v17 = vld [vmem:[%s4958_s7] sm:$0xff]  ;;  %v4208_v20 = vld [vmem:[%s4957_s0 + $0x10] sm:$0x3]  ;;  %v41_v22 = vld [vmem:[%s4958_s7 + $0x18] sm:$0xff]  ;;  %v277_v58 = vrot.slane %v4173_v9, 2 }
   0x6   :  { %3593 = vmatprep.subr.bf16.mxu0 %v4156_v5  ;;  %v4188_v15 = vsel %vm100_vm0, %v101_v10, %v102_v11  ;;  %v4210_v21 = vpack.c.bf16 %v39_v18, %v38_v17  ;;  %v4216_v23 = vpack.c.bf16 %v41_v22, %v40_v19  ;;  %v42_v24 = vld [vmem:[%s4958_s7 + $0x20] sm:$0xff]  ;;  %v43_v25 = vld [vmem:[%s4958_s7 + $0x28] sm:$0xff]  ;;  %v104_v29 = vrot.slane %v4208_v20, 1  ;;  %v80_v31 = vld [vmem:[%s4956_s1 + $0x10] sm:$0xff] }
   0x7   :  { %2988 = vmatprep.mubr.msk.f32.mxu0 %vm106_vm1, %v4188_v15  ;;  %v4229_v26 = vld [vmem:[%s4956_s1 + $0x88] sm:$0xff]  ;;  %v78_v27 = vld [vmem:[%s4956_s1] sm:$0xff]  ;;  %v4240_v30 = vpack.c.bf16 %v43_v25, %v42_v24  ;;  %v81_v32 = vld [vmem:[%s4956_s1 + $0x18] sm:$0xff]  ;;  %v278_v63 = vsel %vm275_vm2, %v276_v57, %v277_v58 }
   0x8   :  { %3637 = vmatprep.subr.bf16.mxu1 %v4210_v21  ;;  %v79_v28 = vld [vmem:[%s4956_s1 + $0x8] sm:$0xff]  ;;  %v44_v34 = vld [vmem:[%s4958_s7 + $0x30] sm:$0xff]  ;;  %v45_v35 = vld [vmem:[%s4958_s7 + $0x38] sm:$0xff]  ;;  %v4259_v36 = vsel %vm100_vm0, %v102_v11, %v104_v29  ;;  %v4262_v37 = vpack.c.bf16 %v81_v32, %v80_v31 }
   0x9   :  { %3595 = vmatpush3.bf16.msra.mxu0 %v4156_v5  ;;  %3639 = vmatpush3.bf16.msra.mxu1 %v4210_v21  ;;  %v4250_v33 = vpack.c.bf16 %v79_v28, %v78_v27  ;;  %v82_v38 = vld [vmem:[%s4956_s1 + $0x20] sm:$0xff]  ;;  %v83_v39 = vld [vmem:[%s4956_s1 + $0x28] sm:$0xff]  ;;  %v4272_v40 = vpack.c.bf16 %v45_v35, %v44_v34  ;;  %v84_v44 = vld [vmem:[%s4956_s1 + $0x30] sm:$0xff] }
   0xa   :  { %3597 = vmatprep.subr.bf16.mxu0 %v4179_v12  ;;  %3641 = vmatprep.subr.bf16.mxu1 %v4216_v23  ;;  %v46_v41 = vld [vmem:[%s4958_s7 + $0x40] sm:$0xff]  ;;  %v47_v42 = vld [vmem:[%s4958_s7 + $0x48] sm:$0xff]  ;;  %v4287_v43 = vpack.c.bf16 %v83_v39, %v82_v38  ;;  %v85_v45 = vld [vmem:[%s4956_s1 + $0x38] sm:$0xff] }
   0xb   :  { %v4297_v46 = vpack.c.bf16 %v47_v42, %v46_v41  ;;  %v48_v47 = vld [vmem:[%s4958_s7 + $0x50] sm:$0xff]  ;;  %v49_v48 = vld [vmem:[%s4958_s7 + $0x58] sm:$0xff]  ;;  %v4307_v49 = vpack.c.bf16 %v85_v45, %v84_v44  ;;  %v50_v51 = vld [vmem:[%s4958_s7 + $0x60] sm:$0xff] }
   0xc   :  { %v4311_v50 = vpack.c.bf16 %v49_v48, %v48_v47  ;;  %v51_v52 = vld [vmem:[%s4958_s7 + $0x68] sm:$0xff]  ;;  %v4325_v53 = vld [vmem:[%s4956_s1 + $0x40] sm:$0xff]  ;;  %v2565_v54 = vld [vmem:[%s4956_s1 + $0x90] sm:$0xff] }
   0xd   :  { %3599 = vmatpush3.bf16.msra.mxu0 %v4179_v12  ;;  %3643 = vmatpush3.bf16.msra.mxu1 %v4216_v23  ;;  %v2566_v55 = vld [vmem:[%s4956_s1 + $0x98] sm:$0xff]  ;;  %v4334_v56 = vpack.c.bf16 %v51_v52, %v50_v51  ;;  %v2567_v59 = vld [vmem:[%s4956_s1 + $0xa0] sm:$0xff]  ;;  %v2568_v60 = vld [vmem:[%s4956_s1 + $0xa8] sm:$0xff] }
   0xe   :  { %3601 = vmatprep.subr.bf16.mxu0 %v4194_v16  ;;  %3645 = vmatprep.subr.bf16.mxu1 %v4240_v30  ;;  %v4346_v61 = vpack.c.bf16 %v2566_v55, %v2565_v54  ;;  %v4350_v62 = vpack.c.bf16 %v2568_v60, %v2567_v59  ;;  %v2569_v0 = vld [vmem:[%s4956_s1 + $0xb0] sm:$0xff]  ;;  %v2570_v1 = vld [vmem:[%s4956_s1 + $0xb8] sm:$0xff]  ;;  %v2571_v4 = vld [vmem:[%s4956_s1 + $0xc0] sm:$0xff] }
   0xf   :  { %v4366_v2 = vpack.c.bf16 %v2570_v1, %v2569_v0  ;;  %v2572_v6 = vld [vmem:[%s4956_s1 + $0xc8] sm:$0xff]  ;;  %v52_v11 = vld [vmem:[%s4958_s7 + $0x70] sm:$0xff]  ;;  %v53_v13 = vld [vmem:[%s4958_s7 + $0x78] sm:$0xff] }
  0x10   :  { %v4377_v7 = vpack.c.bf16 %v2572_v6, %v2571_v4  ;;  %v4400_v14 = vpack.c.bf16 %v53_v13, %v52_v11  ;;  %v54_v17 = vld [vmem:[%s4959_s8] sm:$0xff]  ;;  %v674_v22 = vld [vmem:[%s4960_s2 + $0x10] sm:$0xff]  ;;  %v675_v25 = vld [vmem:[%s4960_s2 + $0x18] sm:$0xff] }
  0x11   :  { %3603 = vmatpush3.bf16.msra.mxu0 %v4194_v16  ;;  %3647 = vmatpush3.bf16.msra.mxu1 %v4240_v30  ;;  %v672_v19 = vld [vmem:[%s4960_s2] sm:$0xff]  ;;  %v4427_v27 = vpack.c.bf16 %v675_v25, %v674_v22  ;;  %v677_v29 = vld [vmem:[%s4960_s2 + $0x28] sm:$0xff]  ;;  %v678_v32 = vld [vmem:[%s4960_s2 + $0x30] sm:$0xff] }
  0x12   :  { %2986 = vmatprep.subr.mxu0 %v4229_v26  ;;  %3649 = vmatprep.subr.bf16.mxu1 %v4272_v40  ;;  %v676_v28 = vld [vmem:[%s4960_s2 + $0x20] sm:$0xff]  ;;  %v679_v34 = vld [vmem:[%s4960_s2 + $0x38] sm:$0xff]  ;;  %v56_v39 = vld [vmem:[%s4959_s8 + $0x10] sm:$0xff] }
  0x13   :  { %v4438_v31 = vpack.c.bf16 %v677_v29, %v676_v28  ;;  %v4448_v35 = vpack.c.bf16 %v679_v34, %v678_v32  ;;  %v4455_v38 = vld [vmem:[%s4960_s2 + $0x40] sm:$0xff]  ;;  %v57_v41 = vld [vmem:[%s4959_s8 + $0x18] sm:$0xff]  ;;  %v59_v45 = vld [vmem:[%s4959_s8 + $0x28] sm:$0xff] }
  0x14   :  { %v4466_v42 = vpack.c.bf16 %v57_v41, %v56_v39  ;;  %v58_v44 = vld [vmem:[%s4959_s8 + $0x20] sm:$0xff]  ;;  %v61_v48 = vld [vmem:[%s4959_s8 + $0x38] sm:$0xff]  ;;  %v63_v54 = vld [vmem:[%s4959_s8 + $0x48] sm:$0xff] }
  0x15   :  { %2987 = vmatpush3.msra.mxu0 %v4229_v26  ;;  %3651 = vmatpush3.bf16.msra.mxu1 %v4272_v40  ;;  %v4479_v47 = vpack.c.bf16 %v59_v45, %v58_v44  ;;  %v62_v52 = vld [vmem:[%s4959_s8 + $0x40] sm:$0xff]  ;;  %v64_v57 = vld [vmem:[%s4959_s8 + $0x50] sm:$0xff]  ;;  %v69_v4 = vld [vmem:[%s4959_s8 + $0x78] sm:$0xff] }
  0x16   :  { %3605 = vmatprep.subr.bf16.mxu0 %v4250_v33  ;;  %2989 = vmatmul.mubr.msk.f32.vlgmr.msra.gmra.mrb[0].mxu0 %vm106_vm1, %v4259_v36  ;;  %v4499_v55 = vpack.c.bf16 %v63_v54, %v62_v52  ;;  %v66_v60 = vld [vmem:[%s4959_s8 + $0x60] sm:$0xff]  ;;  %v68_v1 = vld [vmem:[%s4959_s8 + $0x70] sm:$0xff] }
  0x17   :  { %3607 = vmatpush3.bf16.msra.mxu0 %v4250_v33  ;;  %3009 = vmatprep.mubr.msk.f32.mxu0 %vm106_vm1, %v4168_v8  ;;  %v279_v8 = vrot.slane %v4208_v20, 2  ;;  %v673_v20 = vld [vmem:[%s4960_s2 + $0x8] sm:$0xff]  ;;  %v4529_v6 = vpack.c.bf16 %v69_v4, %v68_v1  ;;  %v4563_v22 = vld [vmem:[%s4962_s5] ss:$0 sm:$0xff] }
  0x18   :  { %3609 = vmatprep.subr.bf16.mxu0 %v4262_v37  ;;  %3653 = vmatprep.subr.bf16.mxu1 %v4297_v46  ;;  %v4422_v24 = vpack.c.bf16 %v673_v20, %v672_v19  ;;  %v4081_v19 = vmov 0.0   ;;  %v4582_v52 = vld [vmem:[%s4964_s10] sm:$0xff] }
  0x19   :  { %3655 = vmatpush3.bf16.msra.mxu1 %v4297_v46  ;;  %v280_v10 = vsel %vm275_vm2, %v277_v58, %v279_v8  ;;  %v65_v58 = vld [vmem:[%s4959_s8 + $0x58] sm:$0xff]  ;;  %v4537_v8 = vld [vmem:[%s4961_s4] ss:$0 sm:$0xff]  ;;  %73 = vst.msk [vmem:[#allocation2] sm:$0x1] %vm72_vm5, %v4081_v19 }
  0x1a   :  { %3657 = vmatprep.subr.bf16.mxu1 %v4311_v50  ;;  %v4509_v59 = vpack.c.bf16 %v65_v58, %v64_v57  ;;  %v1059_v54 = vld [vmem:[%s4965_s3] sm:$0xff]  ;;  %v1060_v57 = vld [vmem:[%s4965_s3 + $0x8] sm:$0xff]  ;;  %74 = vst.msk [vmem:[#allocation2 + $0x9] sm:$0x1] %vm72_vm5, %v4081_v19 }
  0x1b   :  { %3611 = vmatpush3.bf16.msra.mxu0 %v4262_v37  ;;  %v4611_v58 = vpack.c.bf16 %v1060_v57, %v1059_v54  ;;  %v1063_v4 = vld [vmem:[%s4965_s3 + $0x20] sm:$0xff] }
  0x1c   :  { %3613 = vmatprep.subr.bf16.mxu0 %v4287_v43 }
  0x1d   :  { %3659 = vmatpush3.bf16.msra.mxu1 %v4311_v50 }
  0x1e   :  { %3661 = vmatprep.subr.bf16.mxu1 %v4334_v56 }
  0x1f   :  { %3615 = vmatpush3.bf16.msra.mxu0 %v4287_v43 }
  0x20   :  { %3617 = vmatprep.subr.bf16.mxu0 %v4307_v49 }
  0x21   :  { %3663 = vmatpush3.bf16.msra.mxu1 %v4334_v56 }
  0x22   :  { %3665 = vmatprep.subr.bf16.mxu1 %v4400_v14 }
  0x23   :  { %3619 = vmatpush3.bf16.msra.mxu0 %v4307_v49 }
  0x24   :  { %3007 = vmatprep.subr.mxu0 %v4325_v53 }
  0x25   :  { %3667 = vmatpush3.bf16.msra.mxu1 %v4400_v14 }
  0x27   :  { %3008 = vmatpush3.msra.mxu0 %v4325_v53 }
  0x28   :  { %3621 = vmatprep.subr.bf16.mxu0 %v4346_v61  ;;  %3010 = vmatmul.mubr.msk.f32.vlgmr.msra.gmra.mrb[0].mxu0 %vm106_vm1, %v4173_v9  ;;  %v4385_v9 = vld [vmem:[%s4956_s1 + $0xd0] sm:$0xff] }
  0x29   :  { %3623 = vmatpush3.bf16.msra.mxu0 %v4346_v61  ;;  %3030 = vmatprep.mubr.msk.f32.mxu0 %vm106_vm1, %v278_v63  ;;  %v67_v63 = vld [vmem:[%s4959_s8 + $0x68] sm:$0xff] }
  0x2a   :  { %3625 = vmatprep.subr.bf16.mxu0 %v4350_v62  ;;  %v4519_v0 = vpack.c.bf16 %v67_v63, %v66_v60  ;;  %v1061_v60 = vld [vmem:[%s4965_s3 + $0x10] sm:$0xff]  ;;  %v1062_v63 = vld [vmem:[%s4965_s3 + $0x18] sm:$0xff] }
  0x2b   :  { %v4621_v1 = vpack.c.bf16 %v1062_v63, %v1061_v60 }
  0x2d   :  { %3627 = vmatpush3.bf16.msra.mxu0 %v4350_v62 }
  0x2e   :  { %3629 = vmatprep.subr.bf16.mxu0 %v4366_v2 }
  0x31   :  { %3631 = vmatpush3.bf16.msra.mxu0 %v4366_v2 }
  0x32   :  { %3633 = vmatprep.subr.bf16.mxu0 %v4377_v7 }
  0x35   :  { %3635 = vmatpush3.bf16.msra.mxu0 %v4377_v7 }
  0x36   :  { %3028 = vmatprep.subr.mxu0 %v4385_v9 }
  0x39   :  { %3029 = vmatpush3.msra.mxu0 %v4385_v9 }
  0x3a   :  { %3031 = vmatmul.mubr.msk.f32.vlgmr.msra.gmra.mrb[0].mxu0 %vm106_vm1, %v280_v10  ;;  %3707 = vmatprep.subr.bf16.mxu0 %v4422_v24 }
  0x3b   :  { %3135 = vmatprep.mubr.msk.f32.mxu0 %vm106_vm1, %v4188_v15  ;;  %v55_v15 = vld [vmem:[%s4959_s8 + $0x8] sm:$0xff]  ;;  %3709 = vmatpush3.bf16.msra.mxu0 %v4422_v24 }
  0x3c   :  { %v4410_v18 = vpack.c.bf16 %v55_v15, %v54_v17  ;;  %3711 = vmatprep.subr.bf16.mxu0 %v4427_v27  ;;  %v4079_v15 = vmov 0.0|0.0  }
  0x3e   :  { %3669 = vmatprep.subr.bf16.mxu1 %v4410_v18 }
  0x3f   :  { %3713 = vmatpush3.bf16.msra.mxu0 %v4427_v27 }
  0x40   :  { %3715 = vmatprep.subr.bf16.mxu0 %v4438_v31 }
  0x43   :  { %3717 = vmatpush3.bf16.msra.mxu0 %v4438_v31 }
  0x44   :  { %3719 = vmatprep.subr.bf16.mxu0 %v4448_v35 }
  0x47   :  { %3721 = vmatpush3.bf16.msra.mxu0 %v4448_v35 }
  0x48   :  { %3133 = vmatprep.subr.mxu0 %v4455_v38 }
  0x4b   :  { %3134 = vmatpush3.msra.mxu0 %v4455_v38 }
  0x4c   :  { %3136 = vmatmul.mubr.msk.f32.vlgmr.msra.gmra.mrb[2].mxu0 %vm106_vm1, %v4259_v36  ;;  %3755 = vmatprep.subr.bf16.mxu0 %v4410_v18  ;;  %v60_v36 = vld [vmem:[%s4959_s8 + $0x30] sm:$0xff] }
  0x4d   :  { %3757 = vmatpush3.bf16.msra.mxu0 %v4410_v18  ;;  %v4489_v51 = vpack.c.bf16 %v61_v48, %v60_v36  ;;  %v4572_v48 = vld [vmem:[%s4963_s9] sm:$0xff] }
  0x4e   :  { %3759 = vmatprep.subr.bf16.mxu0 %v4466_v42 }
  0x51   :  { %3761 = vmatpush3.bf16.msra.mxu0 %v4466_v42 }
  0x52   :  { %3763 = vmatprep.subr.bf16.mxu0 %v4479_v47 }
  0x55   :  { %3765 = vmatpush3.bf16.msra.mxu0 %v4479_v47 }
  0x56   :  { %3767 = vmatprep.subr.bf16.mxu0 %v4489_v51 }
  0x59   :  { %3769 = vmatpush3.bf16.msra.mxu0 %v4489_v51 }
  0x5a   :  { %3771 = vmatprep.subr.bf16.mxu0 %v4499_v55 }
  0x5d   :  { %3773 = vmatpush3.bf16.msra.mxu0 %v4499_v55 }
  0x5e   :  { %3775 = vmatprep.subr.bf16.mxu0 %v4509_v59 }
  0x61   :  { %3777 = vmatpush3.bf16.msra.mxu0 %v4509_v59 }
  0x62   :  { %3779 = vmatprep.subr.bf16.mxu0 %v4519_v0 }
  0x65   :  { %3781 = vmatpush3.bf16.msra.mxu0 %v4519_v0 }
  0x66   :  { %3783 = vmatprep.subr.bf16.mxu0 %v4529_v6 }
  0x69   :  { %3785 = vmatpush3.bf16.msra.mxu0 %v4529_v6 }
  0x6a   :  { %3804 = vmatprep.subr.bf16.mxu0 %v4079_v15 }
 0x10d   :  { %v3032_v10 = vpop.f32.mrb[0].mxu0 }
 0x10e   :  { %v351_v11 = vpop.f32.mrb[1].mxu0  ;;  %v370_v17 = vadd.f32 %v3032_v10, %v4537_v8  ;;  %v1064_v10 = vld [vmem:[%s4965_s3 + $0x28] sm:$0xff] }
 0x10f   :  { %v369_v13 = vadd.f32 %v4537_v8, %v351_v11  ;;  %v4631_v11 = vpack.c.bf16 %v1064_v10, %v1063_v4  ;;  %v4670_v4 = vld [vmem:[%s4957_s0 + $0x28] sm:$0x3] }
 0x111   :  { %3065 = vmatprep.mubr.f32.mxu1 %v369_v13 }
 0x112   :  { %3066 = vmatmul.mubr.f32.vlgmr.msra.gmra.mrb[0].mxu1 %v370_v17 }
 0x113   :  { %3671 = vmatpush3.bf16.msra.mxu1 %v4410_v18  ;;  %3100 = vmatprep.mubr.f32.mxu1 %v369_v13  ;;  %v1065_v13 = vld [vmem:[%s4965_s3 + $0x30] sm:$0xff] }
 0x114   :  { %3673 = vmatprep.subr.bf16.mxu1 %v4466_v42 }
 0x117   :  { %3675 = vmatpush3.bf16.msra.mxu1 %v4466_v42 }
 0x118   :  { %3677 = vmatprep.subr.bf16.mxu1 %v4479_v47 }
 0x11b   :  { %3679 = vmatpush3.bf16.msra.mxu1 %v4479_v47 }
 0x11c   :  { %3681 = vmatprep.subr.bf16.mxu1 %v4489_v51 }
 0x11f   :  { %3683 = vmatpush3.bf16.msra.mxu1 %v4489_v51  ;;  %v3137_v20 = vpop.f32.mrb[2].mxu0 }
 0x120   :  { %3685 = vmatprep.subr.bf16.mxu1 %v4499_v55  ;;  %v754_v25 = vpop.f32.mrb[3].mxu0  ;;  %v760_v28 = vadd.f32 %v3137_v20, %v4563_v22 }
 0x121   :  { %v755_v29 = vadd.f32 %v4563_v22, %v754_v25 }
 0x123   :  { %3687 = vmatpush3.bf16.msra.mxu1 %v4499_v55  ;;  %3205 = vmatprep.mubr.f32.mxu0 %v755_v29 }
 0x124   :  { %3689 = vmatprep.subr.bf16.mxu1 %v4509_v59  ;;  %3206 = vmatmul.mubr.f32.vlgmr.msra.gmra.mrb[4].mxu0 %v760_v28 }
 0x125   :  { %3257 = vmatprep.mubr.msk.f32.mxu0 %vm4080_vm3, %v4081_v19  ;;  %3806 = vmatpush3.bf16.msra.mxu0 %v4611_v58 }
 0x126   :  { %3807 = vmatprep.subr.bf16.mxu0 %v4079_v15 }
 0x127   :  { %3691 = vmatpush3.bf16.msra.mxu1 %v4509_v59 }
 0x128   :  { %3693 = vmatprep.subr.bf16.mxu1 %v4519_v0 }
 0x129   :  { %3809 = vmatpush3.bf16.msra.mxu0 %v4621_v1 }
 0x12a   :  { %3810 = vmatprep.subr.bf16.mxu0 %v4079_v15 }
 0x12b   :  { %3695 = vmatpush3.bf16.msra.mxu1 %v4519_v0 }
 0x12c   :  { %3697 = vmatprep.subr.bf16.mxu1 %v4529_v6 }
 0x12d   :  { %3812 = vmatpush3.bf16.msra.mxu0 %v4631_v11 }
 0x12e   :  { %3813 = vmatprep.subr.bf16.mxu0 %v4079_v15 }
 0x12f   :  { %3699 = vmatpush3.bf16.msra.mxu1 %v4529_v6 }
 0x130   :  { %3700 = vmatprep.subr.bf16.mxu1 %v4079_v15 }
 0x132   :  { %3101 = vmatmul.mubr.f32.vlgmr.msra.gmra.mrb[2].mxu1 %v370_v17  ;;  %v1066_v17 = vld [vmem:[%s4965_s3 + $0x38] sm:$0xff] }
 0x133   :  { %3107 = vmatprep.mubr.msk.f32.mxu1 %vm4080_vm3, %v4081_v19  ;;  %v4643_v20 = vpack.c.bf16 %v1066_v17, %v1065_v13 }
 0x135   :  { %3815 = vmatpush3.bf16.msra.mxu0 %v4643_v20 }
 0x136   :  { %3829 = vmatprep.subr.bf16.mxu0 %v4151_v3 }
 0x1e5   :  { %v3067_v32 = vpop.f32.mrb[0].mxu1 }
 0x1e6   :  { %v437_v34 = vpop.f32.mrb[1].mxu1 }
 0x1f7   :  { %v3207_v25 = vpop.f32.mrb[4].mxu0 }
 0x205   :  { %v3102_v39 = vpop.f32.mrb[2].mxu1 }
 0x206   :  { %v522_v41 = vmax.f32 %v3067_v32, %v3102_v39  ;;  %v512_v44 = vpop.f32.mrb[3].mxu1 }
 0x207   :  { %v521_v45 = vmax.f32 %v437_v34, %v512_v44 }
 0x209   :  { %v3701_v36 = vpack.c.bf16 %v522_v41, %v521_v45  ;;  %v2604_v45 = vld [vmem:[%s4957_s0 + $0x18] sm:$0xff] }
 0x20a   :  { %v1343_v54 = vrot.slane %v2604_v45, 1 }
 0x20b   :  { %3702 = vmatpush3.bf16.msra.mxu1 %v3701_v36 }
 0x20c   :  { %3703 = vmatprep.subr.bf16.mxu1 %v4079_v15 }
 0x20e   :  { %3108 = vmatmul.mubr.msk.f32.vlgmr.msra.gmra.mrb[4].mxu1 %vm523_vm4, %v4572_v48 }
 0x20f   :  { %3705 = vmatpush3.bf16.msra.mxu1 %v3701_v36  ;;  %3114 = vmatprep.mubr.msk.f32.mxu1 %vm4080_vm3, %v4081_v19  ;;  %v4653_v36 = vld [vmem:[%s4957_s0 + $0x20] sm:$0xff] }
 0x210   :  { %3723 = vmatprep.subr.bf16.mxu1 %v4210_v21  ;;  %v1344_v57 = vrot.slane %v4653_v36, 1 }
 0x212   :  { %3115 = vmatmul.mubr.msk.f32.vlgmr.msra.gmra.mrb[6].mxu1 %vm523_vm4, %v4582_v52  ;;  %v4658_v60 = vsel %vm100_vm0, %v1343_v54, %v1344_v57  ;;  %v2596_v54 = vld [vmem:[%s4965_s3 + $0x90] sm:$0xff] }
 0x213   :  { %3725 = vmatpush3.bf16.msra.mxu1 %v4210_v21  ;;  %3170 = vmatprep.mubr.f32.mxu1 %v755_v29 }
 0x214   :  { %3727 = vmatprep.subr.bf16.mxu1 %v4216_v23 }
 0x217   :  { %3729 = vmatpush3.bf16.msra.mxu1 %v4216_v23 }
 0x218   :  { %3731 = vmatprep.subr.bf16.mxu1 %v4240_v30 }
 0x21b   :  { %3733 = vmatpush3.bf16.msra.mxu1 %v4240_v30 }
 0x21c   :  { %3735 = vmatprep.subr.bf16.mxu1 %v4272_v40 }
 0x21f   :  { %3737 = vmatpush3.bf16.msra.mxu1 %v4272_v40 }
 0x220   :  { %3739 = vmatprep.subr.bf16.mxu1 %v4297_v46 }
 0x223   :  { %3741 = vmatpush3.bf16.msra.mxu1 %v4297_v46 }
 0x224   :  { %3743 = vmatprep.subr.bf16.mxu1 %v4311_v50 }
 0x227   :  { %3745 = vmatpush3.bf16.msra.mxu1 %v4311_v50 }
 0x228   :  { %3747 = vmatprep.subr.bf16.mxu1 %v4334_v56 }
 0x22b   :  { %3749 = vmatpush3.bf16.msra.mxu1 %v4334_v56 }
 0x22c   :  { %3751 = vmatprep.subr.bf16.mxu1 %v4400_v14 }
 0x22f   :  { %3753 = vmatpush3.bf16.msra.mxu1 %v4400_v14 }
 0x230   :  { %3786 = vmatprep.subr.bf16.mxu1 %v4079_v15 }
 0x232   :  { %3171 = vmatmul.mubr.f32.vlgmr.msra.gmra.mrb[8].mxu1 %v760_v28  ;;  %v904_v28 = vpop.f32.mrb[5].mxu0 }
 0x233   :  { %3212 = vmatprep.mubr.msk.f32.mxu1 %vm4080_vm3, %v4081_v19 }
 0x2e1   :  { %v593_v29 = vpop.f32.mrb[4].mxu1 }
 0x2e2   :  { %v3109_v32 = vpop.f32.mrb[5].mxu1 }
 0x2e5   :  { %v666_v34 = vpop.f32.mrb[6].mxu1 }
 0x2e6   :  { %v670_v39 = vmax.f32 %v593_v29, %v666_v34  ;;  %v3116_v41 = vpop.f32.mrb[7].mxu1  ;;  %v1516_v29 = vrot.slane %v4653_v36, 2  ;;  %v2589_v34 = vld [vmem:[%s4965_s3 + $0x68] sm:$0xff] }
 0x2e8   :  { %v671_v44 = vmax.f32 %v670_v39, 0.0 }
 0x2ea   :  { %1057 = vst.msk [vmem:[#allocation2 + $0x1] sm:$0xff] %vm1056_vm6, %v671_v44  ;;  %v2591_v44 = vld [vmem:[%s4965_s3 + $0x78] sm:$0xff] }
 0x2f1   :  { %v1058_v63 = vld [vmem:[#allocation2] sm:$0xff] }
 0x2f2   :  { %3258 = vmatmul.mubr.msk.f32.vlgmr.msra.gmra.mrb[6].mxu0 %vm1056_vm6, %v1058_v63  ;;  %v1067_v63 = vld [vmem:[#allocation2 + $0x1] sm:$0xff] }
 0x2f3   :  { %3831 = vmatpush3.bf16.msra.mxu0 %v4151_v3  ;;  %3297 = vmatprep.mubr.msk.f32.mxu0 %vm106_vm1, %v4658_v60  ;;  %v1346_v3 = vrot.slane %v4670_v4, 1 }
 0x2f4   :  { %3833 = vmatprep.subr.bf16.mxu0 %v4156_v5 }
 0x2f5   :  { %v4678_v10 = vsel %vm100_vm0, %v1344_v57, %v1346_v3  ;;  %v2597_v57 = vld [vmem:[%s4965_s3 + $0x98] sm:$0xff]  ;;  %v1518_v3 = vrot.slane %v4670_v4, 2  ;;  %v2599_v4 = vld [vmem:[%s4965_s3 + $0xa8] sm:$0xff] }
 0x2f7   :  { %3835 = vmatpush3.bf16.msra.mxu0 %v4156_v5 }
 0x2f8   :  { %3837 = vmatprep.subr.bf16.mxu0 %v4179_v12 }
 0x2fb   :  { %3839 = vmatpush3.bf16.msra.mxu0 %v4179_v12 }
 0x2fc   :  { %3841 = vmatprep.subr.bf16.mxu0 %v4194_v16 }
 0x2ff   :  { %3843 = vmatpush3.bf16.msra.mxu0 %v4194_v16 }
 0x300   :  { %3295 = vmatprep.subr.mxu0 %v4229_v26 }
 0x303   :  { %3296 = vmatpush3.msra.mxu0 %v4229_v26  ;;  %v2584_v26 = vld [vmem:[%s4965_s3 + $0x40] sm:$0xff] }
 0x304   :  { %3845 = vmatprep.subr.bf16.mxu0 %v4250_v33  ;;  %3298 = vmatmul.mubr.msk.f32.vlgmr.msra.gmra.mrb[8].mxu0 %vm106_vm1, %v4678_v10 }
 0x305   :  { %3847 = vmatpush3.bf16.msra.mxu0 %v4250_v33  ;;  %v3172_v5 = vpop.f32.mrb[8].mxu1  ;;  %3318 = vmatprep.mubr.msk.f32.mxu0 %vm106_vm1, %v2604_v45  ;;  %v2585_v33 = vld [vmem:[%s4965_s3 + $0x48] sm:$0xff] }
 0x306   :  { %v914_v12 = vmax.f32 %v3172_v5, %v3207_v25  ;;  %v829_v13 = vpop.f32.mrb[9].mxu1  ;;  %3849 = vmatprep.subr.bf16.mxu0 %v4262_v37  ;;  %v2586_v25 = vld [vmem:[%s4965_s3 + $0x50] sm:$0xff]  ;;  %v2598_v5 = vld [vmem:[%s4965_s3 + $0xa0] sm:$0xff] }
 0x307   :  { %v913_v16 = vmax.f32 %v829_v13, %v904_v28  ;;  %v1515_v28 = vrot.slane %v2604_v45, 2  ;;  %v2594_v45 = vld [vmem:[%s4965_s3 + $0x80] sm:$0xff]  ;;  %v2600_v13 = vld [vmem:[%s4965_s3 + $0xb0] sm:$0xff] }
 0x309   :  { %v3787_v17 = vpack.c.bf16 %v914_v12, %v913_v16  ;;  %3851 = vmatpush3.bf16.msra.mxu0 %v4262_v37  ;;  %v4702_v37 = vpack.c.bf16 %v2585_v33, %v2584_v26  ;;  %v1517_v39 = vsel %vm275_vm2, %v1515_v28, %v1516_v29  ;;  %v1519_v12 = vsel %vm275_vm2, %v1516_v29, %v1518_v3  ;;  %v2601_v16 = vld [vmem:[%s4965_s3 + $0xb8] sm:$0xff] }
 0x30a   :  { %3853 = vmatprep.subr.bf16.mxu0 %v4287_v43 }
 0x30b   :  { %3788 = vmatpush3.bf16.msra.mxu1 %v3787_v17 }
 0x30c   :  { %3789 = vmatprep.subr.bf16.mxu1 %v4079_v15 }
 0x30d   :  { %3855 = vmatpush3.bf16.msra.mxu0 %v4287_v43  ;;  %v2587_v43 = vld [vmem:[%s4965_s3 + $0x58] sm:$0xff] }
 0x30e   :  { %3213 = vmatmul.mubr.msk.f32.vlgmr.msra.gmra.mrb[10].mxu1 %vm523_vm4, %v4572_v48  ;;  %3857 = vmatprep.subr.bf16.mxu0 %v4307_v49  ;;  %v4717_v32 = vpack.c.bf16 %v2587_v43, %v2586_v25 }
 0x30f   :  { %3791 = vmatpush3.bf16.msra.mxu1 %v3787_v17  ;;  %3219 = vmatprep.mubr.msk.f32.mxu1 %vm4080_vm3, %v4081_v19  ;;  %v1223_v17 = vld [vmem:[#allocation2 + $0x2] sm:$0xff] }
 0x310   :  { %3792 = vmatprep.subr.bf16.mxu1 %v4079_v15 }
 0x311   :  { %3859 = vmatpush3.bf16.msra.mxu0 %v4307_v49  ;;  %v2588_v49 = vld [vmem:[%s4965_s3 + $0x60] sm:$0xff] }
 0x312   :  { %3220 = vmatmul.mubr.msk.f32.vlgmr.msra.gmra.mrb[12].mxu1 %vm523_vm4, %v4582_v52  ;;  %3316 = vmatprep.subr.mxu0 %v4325_v53  ;;  %v4735_v41 = vpack.c.bf16 %v2589_v34, %v2588_v49 }
 0x313   :  { %3794 = vmatpush3.bf16.msra.mxu1 %v4702_v37  ;;  %3238 = vmatprep.mubr.msk.f32.mxu1 %vm4080_vm3, %v4081_v19 }
 0x314   :  { %3795 = vmatprep.subr.bf16.mxu1 %v4079_v15 }
 0x315   :  { %3317 = vmatpush3.msra.mxu0 %v4325_v53  ;;  %v2590_v53 = vld [vmem:[%s4965_s3 + $0x70] sm:$0xff] }
 0x316   :  { %3861 = vmatprep.subr.bf16.mxu0 %v4346_v61  ;;  %3319 = vmatmul.mubr.msk.f32.vlgmr.msra.gmra.mrb[8].mxu0 %vm106_vm1, %v4653_v36  ;;  %v2595_v36 = vld [vmem:[%s4965_s3 + $0x88] sm:$0xff] }
 0x317   :  { %3863 = vmatpush3.bf16.msra.mxu0 %v4346_v61  ;;  %3797 = vmatpush3.bf16.msra.mxu1 %v4717_v32  ;;  %v4748_v61 = vpack.c.bf16 %v2591_v44, %v2590_v53 }
 0x318   :  { %3865 = vmatprep.subr.bf16.mxu0 %v4350_v62  ;;  %3798 = vmatprep.subr.bf16.mxu1 %v4079_v15 }
 0x319   :  { %3339 = vmatprep.mubr.msk.f32.mxu0 %vm106_vm1, %v1517_v39 }
 0x31b   :  { %3867 = vmatpush3.bf16.msra.mxu0 %v4350_v62  ;;  %3800 = vmatpush3.bf16.msra.mxu1 %v4735_v41  ;;  %v4760_v62 = vpack.c.bf16 %v2595_v36, %v2594_v45 }
 0x31c   :  { %3869 = vmatprep.subr.bf16.mxu0 %v4366_v2  ;;  %3801 = vmatprep.subr.bf16.mxu1 %v4079_v15 }
 0x31f   :  { %3871 = vmatpush3.bf16.msra.mxu0 %v4366_v2  ;;  %3803 = vmatpush3.bf16.msra.mxu1 %v4748_v61  ;;  %v4774_v2 = vpack.c.bf16 %v2597_v57, %v2596_v54 }
 0x320   :  { %3873 = vmatprep.subr.bf16.mxu0 %v4377_v7  ;;  %3816 = vmatprep.subr.bf16.mxu1 %v4079_v15 }
 0x322   :  { %3239 = vmatmul.mubr.msk.f32.vlgmr.msra.gmra.mrb[14].mxu1 %vm1056_vm6, %v1067_v63  ;;  %v4833_v63 = vld [vmem:[%s4966_s6] ss:$0 sm:$0xff] }
 0x323   :  { %3875 = vmatpush3.bf16.msra.mxu0 %v4377_v7  ;;  %3818 = vmatpush3.bf16.msra.mxu1 %v4760_v62  ;;  %v4789_v7 = vpack.c.bf16 %v2599_v4, %v2598_v5 }
 0x324   :  { %3337 = vmatprep.subr.mxu0 %v4385_v9  ;;  %3819 = vmatprep.subr.bf16.mxu1 %v4079_v15 }
 0x325   :  { %3276 = vmatprep.mubr.msk.f32.mxu1 %vm4080_vm3, %v4081_v19 }
 0x327   :  { %3338 = vmatpush3.msra.mxu0 %v4385_v9  ;;  %3821 = vmatpush3.bf16.msra.mxu1 %v4774_v2  ;;  %v4803_v9 = vpack.c.bf16 %v2601_v16, %v2600_v13 }
 0x328   :  { %3340 = vmatmul.mubr.msk.f32.vlgmr.msra.gmra.mrb[8].mxu0 %vm106_vm1, %v1519_v12  ;;  %3822 = vmatprep.subr.bf16.mxu1 %v4079_v15 }
 0x329   :  { %3940 = vmatprep.subr.bf16.mxu0 %v4079_v15  ;;  %3416 = vmatprep.mubr.msk.f32.mxu0 %vm4080_vm3, %v4081_v19 }
 0x32b   :  { %3824 = vmatpush3.bf16.msra.mxu1 %v4789_v7 }
 0x32c   :  { %3825 = vmatprep.subr.bf16.mxu1 %v4079_v15 }
 0x32f   :  { %3827 = vmatpush3.bf16.msra.mxu1 %v4803_v9 }
 0x330   :  { %3877 = vmatprep.subr.bf16.mxu1 %v4210_v21 }
 0x332   :  { %3277 = vmatmul.mubr.msk.f32.vlgmr.msra.gmra.mrb[16].mxu1 %vm1056_vm6, %v1223_v17 }
 0x333   :  { %3879 = vmatpush3.bf16.msra.mxu1 %v4210_v21 }
 0x334   :  { %3881 = vmatprep.subr.bf16.mxu1 %v4216_v23 }
 0x337   :  { %3883 = vmatpush3.bf16.msra.mxu1 %v4216_v23 }
 0x338   :  { %3885 = vmatprep.subr.bf16.mxu1 %v4240_v30 }
 0x33b   :  { %3887 = vmatpush3.bf16.msra.mxu1 %v4240_v30 }
 0x33c   :  { %3889 = vmatprep.subr.bf16.mxu1 %v4272_v40 }
 0x33f   :  { %3891 = vmatpush3.bf16.msra.mxu1 %v4272_v40 }
 0x340   :  { %3893 = vmatprep.subr.bf16.mxu1 %v4297_v46 }
 0x343   :  { %3895 = vmatpush3.bf16.msra.mxu1 %v4297_v46 }
 0x344   :  { %3897 = vmatprep.subr.bf16.mxu1 %v4311_v50 }
 0x347   :  { %3899 = vmatpush3.bf16.msra.mxu1 %v4311_v50 }
 0x348   :  { %3901 = vmatprep.subr.bf16.mxu1 %v4334_v56 }
 0x34b   :  { %3903 = vmatpush3.bf16.msra.mxu1 %v4334_v56 }
 0x34c   :  { %3905 = vmatprep.subr.bf16.mxu1 %v4400_v14 }
 0x34f   :  { %3907 = vmatpush3.bf16.msra.mxu1 %v4400_v14 }
 0x350   :  { %3909 = vmatprep.subr.bf16.mxu1 %v4410_v18 }
 0x3c5   :  { %v1219_v26 = vpop.f32.mrb[6].mxu0 }
 0x3c6   :  { %v3259_v33 = vpop.f32.mrb[7].mxu0 }
 0x3e1   :  { %v981_v25 = vpop.f32.mrb[10].mxu1 }
 0x3e2   :  { %v3214_v43 = vpop.f32.mrb[11].mxu1 }
 0x3e5   :  { %v1051_v28 = vpop.f32.mrb[12].mxu1 }
 0x3e6   :  { %v1055_v29 = vmax.f32 %v981_v25, %v1051_v28  ;;  %v3221_v49 = vpop.f32.mrb[13].mxu1 }
 0x3f5   :  { %v1146_v34 = vpop.f32.mrb[14].mxu1 }
 0x3f6   :  { %v1220_v39 = vadd.f32 %v1219_v26, %v1146_v34  ;;  %v3240_v53 = vpop.f32.mrb[15].mxu1 }
 0x3fb   :  { %v3341_v44 = vpop.f32.mrb[8].mxu0 }
 0x3fc   :  { %v1590_v45 = vpop.f32.mrb[9].mxu0  ;;  %v1609_v54 = vadd.f32 %v3341_v44, %v4537_v8 }
 0x3fd   :  { %v1608_v36 = vadd.f32 %v4537_v8, %v1590_v45 }
 0x3ff   :  { %3374 = vmatprep.mubr.f32.mxu1 %v1608_v36 }
 0x400   :  { %3375 = vmatmul.mubr.f32.vlgmr.msra.gmra.mrb[18].mxu1 %v1609_v54 }
 0x401   :  { %3911 = vmatpush3.bf16.msra.mxu1 %v4410_v18  ;;  %3409 = vmatprep.mubr.f32.mxu1 %v1608_v36 }
 0x402   :  { %3913 = vmatprep.subr.bf16.mxu1 %v4466_v42 }
 0x405   :  { %3915 = vmatpush3.bf16.msra.mxu1 %v4466_v42  ;;  %v1302_v57 = vpop.f32.mrb[16].mxu1 }
 0x406   :  { %v1306_v3 = vadd.f32 %v1302_v57, %v1220_v39  ;;  %v3278_v5 = vpop.f32.mrb[17].mxu1  ;;  %3917 = vmatprep.subr.bf16.mxu1 %v4479_v47 }
 0x408   :  { %v1314_v8 = vadd.f32 %v4833_v63, %v1306_v3 }
 0x409   :  { %3919 = vmatpush3.bf16.msra.mxu1 %v4479_v47 }
 0x40a   :  { %v1315_v4 = vadd.f32 %v1314_v8, %v1055_v29  ;;  %3921 = vmatprep.subr.bf16.mxu1 %v4489_v51 }
 0x40c   :  { %v1316_v12 = vmax.f32 %v1315_v4, 0.0 }
 0x40d   :  { %3923 = vmatpush3.bf16.msra.mxu1 %v4489_v51 }
 0x40e   :  { %1317 = vst.msk [vmem:[%s4967_s11] sm:$0xff] %vm1056_vm6, %v1316_v12  ;;  %3925 = vmatprep.subr.bf16.mxu1 %v4499_v55 }
 0x411   :  { %3927 = vmatpush3.bf16.msra.mxu1 %v4499_v55 }
 0x412   :  { %3929 = vmatprep.subr.bf16.mxu1 %v4509_v59 }
 0x415   :  { %3931 = vmatpush3.bf16.msra.mxu1 %v4509_v59 }
 0x416   :  { %3933 = vmatprep.subr.bf16.mxu1 %v4519_v0 }
 0x419   :  { %3935 = vmatpush3.bf16.msra.mxu1 %v4519_v0 }
 0x41a   :  { %3937 = vmatprep.subr.bf16.mxu1 %v4529_v6 }
 0x41d   :  { %3939 = vmatpush3.bf16.msra.mxu1 %v4529_v6 }
 0x41e   :  { %3963 = vmatprep.subr.bf16.mxu1 %v4210_v21 }
 0x420   :  { %3410 = vmatmul.mubr.f32.vlgmr.msra.gmra.mrb[20].mxu1 %v1609_v54 }
 0x421   :  { %3965 = vmatpush3.bf16.msra.mxu1 %v4210_v21 }
 0x422   :  { %3967 = vmatprep.subr.bf16.mxu1 %v4216_v23 }
 0x425   :  { %3969 = vmatpush3.bf16.msra.mxu1 %v4216_v23 }
 0x426   :  { %3971 = vmatprep.subr.bf16.mxu1 %v4240_v30 }
 0x429   :  { %3973 = vmatpush3.bf16.msra.mxu1 %v4240_v30 }
 0x42a   :  { %3975 = vmatprep.subr.bf16.mxu1 %v4272_v40 }
 0x42d   :  { %3977 = vmatpush3.bf16.msra.mxu1 %v4272_v40 }
 0x42e   :  { %3979 = vmatprep.subr.bf16.mxu1 %v4297_v46 }
 0x431   :  { %3981 = vmatpush3.bf16.msra.mxu1 %v4297_v46 }
 0x432   :  { %3983 = vmatprep.subr.bf16.mxu1 %v4311_v50 }
 0x435   :  { %3985 = vmatpush3.bf16.msra.mxu1 %v4311_v50 }
 0x436   :  { %3987 = vmatprep.subr.bf16.mxu1 %v4334_v56 }
 0x439   :  { %3989 = vmatpush3.bf16.msra.mxu1 %v4334_v56 }
 0x43a   :  { %3991 = vmatprep.subr.bf16.mxu1 %v4400_v14 }
 0x43d   :  { %3993 = vmatpush3.bf16.msra.mxu1 %v4400_v14 }
 0x43e   :  { %4026 = vmatprep.subr.bf16.mxu1 %v4079_v15 }
 0x4d3   :  { %v3376_v21 = vpop.f32.mrb[18].mxu1 }
 0x4d4   :  { %v1676_v23 = vpop.f32.mrb[19].mxu1 }
 0x4f3   :  { %v3411_v30 = vpop.f32.mrb[20].mxu1 }
 0x4f4   :  { %v1761_v40 = vmax.f32 %v3376_v21, %v3411_v30  ;;  %v1751_v13 = vpop.f32.mrb[21].mxu1 }
 0x4f5   :  { %v1760_v46 = vmax.f32 %v1676_v23, %v1751_v13 }
 0x4f7   :  { %v3941_v16 = vpack.c.bf16 %v1761_v40, %v1760_v46 }
 0x4f9   :  { %3942 = vmatpush3.bf16.msra.mxu0 %v3941_v16 }
 0x4fa   :  { %3943 = vmatprep.subr.bf16.mxu0 %v4079_v15 }
 0x4fc   :  { %3417 = vmatmul.mubr.msk.f32.vlgmr.msra.gmra.mrb[10].mxu0 %vm523_vm4, %v4572_v48 }
 0x4fd   :  { %3945 = vmatpush3.bf16.msra.mxu0 %v3941_v16  ;;  %3423 = vmatprep.mubr.msk.f32.mxu0 %vm4080_vm3, %v4081_v19 }
 0x4fe   :  { %3947 = vmatprep.subr.bf16.mxu0 %v4422_v24 }
 0x500   :  { %3424 = vmatmul.mubr.msk.f32.vlgmr.msra.gmra.mrb[12].mxu0 %vm523_vm4, %v4582_v52 }
 0x501   :  { %3949 = vmatpush3.bf16.msra.mxu0 %v4422_v24  ;;  %3444 = vmatprep.mubr.msk.f32.mxu0 %vm106_vm1, %v4658_v60 }
 0x502   :  { %3951 = vmatprep.subr.bf16.mxu0 %v4427_v27 }
 0x505   :  { %3953 = vmatpush3.bf16.msra.mxu0 %v4427_v27 }
 0x506   :  { %3955 = vmatprep.subr.bf16.mxu0 %v4438_v31 }
 0x509   :  { %3957 = vmatpush3.bf16.msra.mxu0 %v4438_v31 }
 0x50a   :  { %3959 = vmatprep.subr.bf16.mxu0 %v4448_v35 }
 0x50d   :  { %3961 = vmatpush3.bf16.msra.mxu0 %v4448_v35 }
 0x50e   :  { %3442 = vmatprep.subr.mxu0 %v4455_v38 }
 0x511   :  { %3443 = vmatpush3.msra.mxu0 %v4455_v38 }
 0x512   :  { %3445 = vmatmul.mubr.msk.f32.vlgmr.msra.gmra.mrb[14].mxu0 %vm106_vm1, %v4678_v10  ;;  %3995 = vmatprep.subr.bf16.mxu0 %v4410_v18 }
 0x513   :  { %3997 = vmatpush3.bf16.msra.mxu0 %v4410_v18 }
 0x514   :  { %3999 = vmatprep.subr.bf16.mxu0 %v4466_v42 }
 0x517   :  { %4001 = vmatpush3.bf16.msra.mxu0 %v4466_v42 }
 0x518   :  { %4003 = vmatprep.subr.bf16.mxu0 %v4479_v47 }
 0x51b   :  { %4005 = vmatpush3.bf16.msra.mxu0 %v4479_v47 }
 0x51c   :  { %4007 = vmatprep.subr.bf16.mxu0 %v4489_v51 }
 0x51f   :  { %4009 = vmatpush3.bf16.msra.mxu0 %v4489_v51 }
 0x520   :  { %4011 = vmatprep.subr.bf16.mxu0 %v4499_v55 }
 0x523   :  { %4013 = vmatpush3.bf16.msra.mxu0 %v4499_v55 }
 0x524   :  { %4015 = vmatprep.subr.bf16.mxu0 %v4509_v59 }
 0x527   :  { %4017 = vmatpush3.bf16.msra.mxu0 %v4509_v59 }
 0x528   :  { %4019 = vmatprep.subr.bf16.mxu0 %v4519_v0 }
 0x52b   :  { %4021 = vmatpush3.bf16.msra.mxu0 %v4519_v0 }
 0x52c   :  { %4023 = vmatprep.subr.bf16.mxu0 %v4529_v6 }
 0x52f   :  { %4025 = vmatpush3.bf16.msra.mxu0 %v4529_v6 }
 0x530   :  { %4032 = vmatprep.subr.bf16.mxu0 %v4079_v15 }
 0x5cf   :  { %v1828_v50 = vpop.f32.mrb[10].mxu0 }
 0x5d0   :  { %v3418_v56 = vpop.f32.mrb[11].mxu0 }
 0x5d3   :  { %v1898_v14 = vpop.f32.mrb[12].mxu0 }
 0x5d4   :  { %v1902_v18 = vmax.f32 %v1828_v50, %v1898_v14  ;;  %v3425_v24 = vpop.f32.mrb[13].mxu0 }
 0x5d6   :  { %v1903_v27 = vmax.f32 %v1902_v18, 0.0 }
 0x5d8   :  { %2288 = vst.msk [vmem:[#allocation2 + $0x1] sm:$0xff] %vm1056_vm6, %v1903_v27 }
 0x5df   :  { %v2298_v47 = vld [vmem:[#allocation2 + $0x1] sm:$0xff] }
 0x5e0   :  { %v2453_v51 = vld [vmem:[#allocation2 + $0x2] sm:$0xff] }
 0x5e5   :  { %v3446_v31 = vpop.f32.mrb[14].mxu0 }
 0x5e6   :  { %v1986_v35 = vpop.f32.mrb[15].mxu0  ;;  %v1992_v42 = vadd.f32 %v3446_v31, %v4563_v22 }
 0x5e7   :  { %v1987_v38 = vadd.f32 %v4563_v22, %v1986_v35 }
 0x5e9   :  { %3479 = vmatprep.mubr.f32.mxu1 %v1987_v38  ;;  %3514 = vmatprep.mubr.f32.mxu0 %v1987_v38 }
 0x5ea   :  { %3480 = vmatmul.mubr.f32.vlgmr.msra.gmra.mrb[22].mxu1 %v1992_v42  ;;  %3515 = vmatmul.mubr.f32.vlgmr.msra.gmra.mrb[16].mxu0 %v1992_v42 }
 0x5eb   :  { %4034 = vmatpush3.bf16.msra.mxu0 %v4702_v37  ;;  %3547 = vmatprep.mubr.msk.f32.mxu0 %vm4080_vm3, %v4081_v19 }
 0x5ec   :  { %4035 = vmatprep.subr.bf16.mxu0 %v4079_v15  ;;  %3521 = vmatprep.mubr.msk.f32.mxu1 %vm4080_vm3, %v4081_v19 }
 0x5ef   :  { %4037 = vmatpush3.bf16.msra.mxu0 %v4717_v32 }
 0x5f0   :  { %4038 = vmatprep.subr.bf16.mxu0 %v4079_v15 }
 0x5f3   :  { %4040 = vmatpush3.bf16.msra.mxu0 %v4735_v41 }
 0x5f4   :  { %4041 = vmatprep.subr.bf16.mxu0 %v4079_v15 }
 0x5f7   :  { %4043 = vmatpush3.bf16.msra.mxu0 %v4748_v61 }
 0x5f8   :  { %4056 = vmatprep.subr.bf16.mxu0 %v4079_v15 }
 0x5fa   :  { %3548 = vmatmul.mubr.msk.f32.vlgmr.msra.gmra.mrb[18].mxu0 %vm1056_vm6, %v2298_v47 }
 0x5fb   :  { %4058 = vmatpush3.bf16.msra.mxu0 %v4760_v62  ;;  %3585 = vmatprep.mubr.msk.f32.mxu0 %vm4080_vm3, %v4081_v19 }
 0x5fc   :  { %4059 = vmatprep.subr.bf16.mxu0 %v4079_v15 }
 0x5ff   :  { %4061 = vmatpush3.bf16.msra.mxu0 %v4774_v2 }
 0x600   :  { %4062 = vmatprep.subr.bf16.mxu0 %v4079_v15 }
 0x603   :  { %4064 = vmatpush3.bf16.msra.mxu0 %v4789_v7 }
 0x604   :  { %4065 = vmatprep.subr.bf16.mxu0 %v4079_v15 }
 0x607   :  { %4067 = vmatpush3.bf16.msra.mxu0 %v4803_v9 }
 0x60a   :  { %3586 = vmatmul.mubr.msk.f32.vlgmr.msra.gmra.mrb[20].mxu0 %vm1056_vm6, %v2453_v51 }
 0x6bd   :  { %v3481_v55 = vpop.f32.mrb[22].mxu1  ;;  %v3516_v59 = vpop.f32.mrb[16].mxu0 }
 0x6be   :  { %v2146_v0 = vmax.f32 %v3481_v55, %v3516_v59  ;;  %v2061_v6 = vpop.f32.mrb[23].mxu1  ;;  %v2136_v22 = vpop.f32.mrb[17].mxu0 }
 0x6bf   :  { %v2145_v60 = vmax.f32 %v2061_v6, %v2136_v22 }
 0x6c1   :  { %v4027_v10 = vpack.c.bf16 %v2146_v0, %v2145_v60 }
 0x6c3   :  { %4028 = vmatpush3.bf16.msra.mxu1 %v4027_v10 }
 0x6c4   :  { %4029 = vmatprep.subr.bf16.mxu1 %v4079_v15 }
 0x6c6   :  { %3522 = vmatmul.mubr.msk.f32.vlgmr.msra.gmra.mrb[24].mxu1 %vm523_vm4, %v4572_v48  ;;  %v2289_v48 = vld [vmem:[#allocation2] sm:$0xff] }
 0x6c7   :  { %4031 = vmatpush3.bf16.msra.mxu1 %v4027_v10  ;;  %3528 = vmatprep.mubr.msk.f32.mxu1 %vm4080_vm3, %v4081_v19 }
 0x6c8   :  { %4044 = vmatprep.subr.bf16.mxu1 %v4079_v15 }
 0x6ca   :  { %3529 = vmatmul.mubr.msk.f32.vlgmr.msra.gmra.mrb[26].mxu1 %vm523_vm4, %v4582_v52 }
 0x6cb   :  { %4046 = vmatpush3.bf16.msra.mxu1 %v4611_v58  ;;  %3566 = vmatprep.mubr.msk.f32.mxu1 %vm4080_vm3, %v4081_v19 }
 0x6cc   :  { %4047 = vmatprep.subr.bf16.mxu1 %v4079_v15 }
 0x6cd   :  { %v2376_v37 = vpop.f32.mrb[18].mxu0 }
 0x6ce   :  { %v3549_v32 = vpop.f32.mrb[19].mxu0 }
 0x6cf   :  { %4049 = vmatpush3.bf16.msra.mxu1 %v4621_v1 }
 0x6d0   :  { %4050 = vmatprep.subr.bf16.mxu1 %v4079_v15 }
 0x6d3   :  { %4052 = vmatpush3.bf16.msra.mxu1 %v4631_v11 }
 0x6d4   :  { %4053 = vmatprep.subr.bf16.mxu1 %v4079_v15 }
 0x6d7   :  { %4055 = vmatpush3.bf16.msra.mxu1 %v4643_v20 }
 0x6da   :  { %3567 = vmatmul.mubr.msk.f32.vlgmr.msra.gmra.mrb[28].mxu1 %vm1056_vm6, %v2289_v48 }
 0x6dd   :  { %v2531_v52 = vpop.f32.mrb[20].mxu0 }
 0x6de   :  { %v3587_v58 = vpop.f32.mrb[21].mxu0 }
 0x799   :  { %v2213_v19 = vpop.f32.mrb[24].mxu1 }
 0x79a   :  { %v3523_v41 = vpop.f32.mrb[25].mxu1 }
 0x79d   :  { %v2283_v61 = vpop.f32.mrb[26].mxu1 }
 0x79e   :  { %v2287_v62 = vmax.f32 %v2213_v19, %v2283_v61  ;;  %v3530_v2 = vpop.f32.mrb[27].mxu1 }
 0x7ad   :  { %v2449_v7 = vpop.f32.mrb[28].mxu1 }
 0x7ae   :  { %v2450_v1 = vadd.f32 %v2449_v7, %v2376_v37  ;;  %v3568_v9 = vpop.f32.mrb[29].mxu1 }
 0x7b0   :  { %v2535_v17 = vadd.f32 %v2531_v52, %v2450_v1 }
 0x7b2   :  { %v2543_v11 = vadd.f32 %v4833_v63, %v2535_v17 }
 0x7b4   :  { %v2544_v26 = vadd.f32 %v2543_v11, %v2287_v62 }
 0x7b6   :  { %v2545_v15 = vmax.f32 %v2544_v26, 0.0 }
 0x7b8   :  { %2659 = vst.msk [vmem:[%s4967_s11 + $0x8] sm:$0xff] %vm1056_vm6, %v2545_v15 }

</bundles_post_ra>
